<compile_context>
chip_gen: v7x
topology: tpu7x:2x2x1
jax: 0.10.0
libtpu: 0.0.40
codegen_flags: <defaults>
</compile_context>

<pallas_src>
import jax
import jax.numpy as jnp
from jax import lax
from jax.experimental import pallas as pl
from jax.experimental.pallas import tpu as pltpu


# --------------------------------------------------------------------------
# Fused kernel: per batch element
#   (main | ext1) 1x1 conv (one matmul) + folded-BN bias + PReLU
#   -> parity block-matmul ConvTranspose + BN + PReLU
#   -> block-diagonal ext3 1x1 conv + BN + PReLU
#   -> MaxUnpool2d(2) of the main branch + residual add + out PReLU
# All intermediates stay in VMEM; output block is (1, H, 2, W, 2*Co), which
# is bit-identical to NHWC (1, 2H, 2W, Co).
# --------------------------------------------------------------------------
def _upsampling_bottleneck_kernel(al_ref, x_ref, idx_ref, wcat_ref,
                                  bm_ref, be1_ref, w2_ref, b2_ref,
                                  w3_ref, b3_ref, o_ref, e1p_ref):
    _, H, _, W, Co2 = o_ref.shape
    Co = Co2 // 2
    Ci = e1p_ref.shape[2]
    HW = H * W

    a_main = al_ref[0, 0]
    a_ext1 = al_ref[0, 1]
    a_ext2 = al_ref[0, 2]
    a_ext3 = al_ref[0, 3]
    a_out = al_ref[0, 4]

    # ---- fused (main | ext1) 1x1 conv: one MXU matmul, BN scale pre-folded ----
    y = jnp.dot(x_ref[0], wcat_ref[...], preferred_element_type=jnp.float32)
    main2d = y[:, :Co] + bm_ref[...]
    main2d = jnp.where(main2d > 0, main2d, a_main * main2d)         # PReLU
    e1 = y[:, Co:Co + Ci] + be1_ref[...]
    e1 = jnp.where(e1 > 0, e1, a_ext1 * e1)                         # PReLU

    # ---- zero-halo'd ext1 in a VMEM scratch; gather the 4 shifted views ----
    e1p_ref[...] = jnp.zeros((H + 1, W + 1, Ci), jnp.float32)
    e1p_ref[0:H, 0:W, :] = e1.reshape(H, W, Ci)
    x01 = e1p_ref[0:H, 1:W + 1, :].reshape(HW, Ci)                  # (h, w+1)
    x10 = e1p_ref[1:H + 1, 0:W, :].reshape(HW, Ci)                  # (h+1, w)
    x11 = e1p_ref[1:H + 1, 1:W + 1, :].reshape(HW, Ci)              # (h+1, w+1)
    xv = jnp.concatenate([e1, x01, x10, x11], axis=1)               # (HW, 4*Ci)

    # ---- ConvTranspose via ONE parity block-matmul + BN + PReLU ----
    e2 = jnp.dot(xv, w2_ref[...], preferred_element_type=jnp.float32)
    e2 = e2 + b2_ref[...]
    e2 = jnp.where(e2 > 0, e2, a_ext2 * e2)                         # (HW, 4*Ci)

    # ---- ext3 1x1 conv: block-diagonal over the 4 parity classes ----
    e3 = jnp.dot(e2, w3_ref[...], preferred_element_type=jnp.float32)
    e3 = e3 + b3_ref[...]
    e3 = jnp.where(e3 > 0, e3, a_ext3 * e3)                         # (HW, 4*Co)

    # ---- MaxUnpool2d(2) parity class map (hoisted, no iota when 2W = 2^k) ----
    # idx = (2h+dh)*2W + (2w+dw)  ->  rowpar = dh, colpar = dw.
    idx_v = idx_ref[0]                                              # (H, W, Co)
    W2 = 2 * W
    if (W2 & (W2 - 1)) == 0:
        row_par = (idx_v >> (W2.bit_length() - 1)) & 1
    else:
        h_iota = lax.broadcasted_iota(jnp.int32, (H, W, Co), 0)
        row_par = (idx_v - h_iota * (2 * W2) >= W2).astype(jnp.int32)
    cls = 2 * row_par + (idx_v & 1)                                 # in {0..3}

    main_v = main2d.reshape(H, W, Co)
    main_w = jnp.concatenate([main_v, main_v], axis=-1)             # (H, W, 2*Co)
    cls_w = jnp.concatenate([cls, cls - 1], axis=-1)                # (H, W, 2*Co)

    # ---- per output-row-parity dh: unpool + residual + out PReLU ----
    # e3 columns are ordered by class j = 2*dh + dw, so the dw=0 / dw=1
    # blocks for a given dh are already lane-adjacent -> one dense store/dh.
    for dh in range(2):
        e3d = e3[:, dh * 2 * Co:(dh + 1) * 2 * Co].reshape(H, W, 2 * Co)
        unpooled = jnp.where(cls_w == 2 * dh, main_w, 0.0)
        out_v = unpooled + e3d
        o_ref[0, :, dh, :, :] = jnp.where(out_v > 0, out_v, a_out * out_v)


def _vmem_bytes_estimate(H, W, Cin, Ci, Co):
    f32 = 4
    blocks = f32 * (H * W * Cin + H * W * Co + 4 * H * W * Co)      # x, idx, out
    temps = f32 * (H * W * (Co + Ci)                                # y
                   + (H + 1) * (W + 1) * Ci                         # halo scratch
                   + 6 * H * W * 4 * Ci                             # views / xv / e2
                   + 2 * H * W * 4 * Co                             # e3
                   + 6 * H * W * 2 * Co)                            # masks / slabs
    return 2 * blocks + temps                                       # blocks double-buffered


# --------------------------------------------------------------------------
# Full UpsamplingBottleneck forward (host wrapper)
# --------------------------------------------------------------------------
def upsampling_bottleneck_forward(x_nchw, max_indices_nchw, p):
    Nb, Cin, H, W = x_nchw.shape
    Co = p['w_main'].shape[1]
    Ci = p['w_ext1'].shape[1]

    # TODO(synk): keep the pipeline NHWC end-to-end (or emit NCHW directly
    # from the kernel) to drop these boundary transposes; each is a full HBM
    # pass on a memory-bound op.
    x = jnp.transpose(x_nchw, (0, 2, 3, 1)).astype(jnp.float32)     # NHWC
    idx = jnp.transpose(max_indices_nchw, (0, 2, 3, 1)).astype(jnp.int32)
    x2d = x.reshape(Nb, H * W, Cin)

    # ---- fold BN scale into the 1x1 weights; fuse main | ext1 columns ----
    wcat = jnp.concatenate([p['w_main'] * p['s_main'],
                            p['w_ext1'] * p['s_ext1']], axis=1)     # (Cin, Co+Ci)

    # ---- parity-stacked ConvTranspose weights: (4*Ci, 4*Ci) block matrix ----
    # row blocks r: shifted views [(h,w), (h,w+1), (h+1,w), (h+1,w+1)]
    # col blocks j: output parity class j = 2*dh + dw
    w2s = (jnp.transpose(p['w_ext2'], (2, 3, 0, 1))
           * p['s_ext2'].reshape(1, 1, 1, Ci))                      # (3,3,Ci,Ci)
    taps = {0: ((0, 1, 1),),
            1: ((0, 1, 2), (1, 1, 0)),
            2: ((0, 2, 1), (2, 0, 1)),
            3: ((0, 2, 2), (1, 2, 0), (2, 0, 2), (3, 0, 0))}
    w2cat = jnp.zeros((4 * Ci, 4 * Ci), jnp.float32)
    for j, lst in taps.items():
        for (r, kh, kw) in lst:
            w2cat = w2cat.at[r * Ci:(r + 1) * Ci,
                             j * Ci:(j + 1) * Ci].set(w2s[kh, kw])
    b2cat = jnp.tile(p['b_ext2'], (1, 4))                           # (1, 4*Ci)

    # ---- ext3 weights, block-diagonal over the 4 parity classes ----
    w3s = p['w_ext3'] * p['s_ext3']                                 # (Ci, Co)
    w3diag = jnp.zeros((4 * Ci, 4 * Co), jnp.float32)
    for j in range(4):
        w3diag = w3diag.at[j * Ci:(j + 1) * Ci,
                           j * Co:(j + 1) * Co].set(w3s)
    b3cat = jnp.tile(p['b_ext3'], (1, 4))                           # (1, 4*Co)

    alphas = jnp.concatenate(
        [p['a_main'][0], p['a_ext1'][0], p['a_ext2'][0], p['a_ext3'][0],
         p['a_out'][0], jnp.zeros((3,), jnp.float32)]).reshape(1, 8)

    vmem_limit = int(min(64 * 2 ** 20,
                         max(32 * 2 ** 20,
                             _vmem_bytes_estimate(H, W, Cin, Ci, Co))))

    # TODO(synk): for very large H*W (v7x: 64 MiB VMEM) add an H-tile grid
    # axis with a 1-row halo instead of whole-image-per-batch blocks.
    out5 = pl.pallas_call(
        _upsampling_bottleneck_kernel,
        out_shape=jax.ShapeDtypeStruct((Nb, H, 2, W, 2 * Co), jnp.float32),
        grid=(Nb,),
        in_specs=[
            pl.BlockSpec((1, 8), lambda n: (0, 0),
                         memory_space=pltpu.MemorySpace.SMEM),
            pl.BlockSpec((1, H * W, Cin), lambda n: (n, 0, 0)),
            pl.BlockSpec((1, H, W, Co), lambda n: (n, 0, 0, 0)),
            pl.BlockSpec((Cin, Co + Ci), lambda n: (0, 0)),
            pl.BlockSpec((1, Co), lambda n: (0, 0)),
            pl.BlockSpec((1, Ci), lambda n: (0, 0)),
            pl.BlockSpec((4 * Ci, 4 * Ci), lambda n: (0, 0)),
            pl.BlockSpec((1, 4 * Ci), lambda n: (0, 0)),
            pl.BlockSpec((4 * Ci, 4 * Co), lambda n: (0, 0)),
            pl.BlockSpec((1, 4 * Co), lambda n: (0, 0)),
        ],
        out_specs=pl.BlockSpec((1, H, 2, W, 2 * Co),
                               lambda n: (n, 0, 0, 0, 0)),
        scratch_shapes=[pltpu.VMEM((H + 1, W + 1, Ci), jnp.float32)],
        compiler_params=pltpu.CompilerParams(
            dimension_semantics=("parallel",),
            vmem_limit_bytes=vmem_limit),
    )(alphas, x2d, idx, wcat, p['b_main'], p['b_ext1'],
      w2cat, b2cat, w3diag, b3cat)

    # (Nb, H, 2, W, 2*Co) is bit-identical to (Nb, 2H, 2W, Co): free reshape.
    out = out5.reshape(Nb, 2 * H, 2 * W, Co)
    # Dropout2d(p=0) is exactly the identity.
    return jnp.transpose(out, (0, 3, 1, 2))                         # NCHW


# --------------------------------------------------------------------------
# Deterministic parameter init (synthetic, matches module shapes)
# --------------------------------------------------------------------------
def make_params(key, Cin, Cout, ratio=4):
    Ci = Cin // ratio
    ks = jax.random.split(key, 8)

    def bn(k, c):
        k1, k2, k3, k4 = jax.random.split(k, 4)
        gamma = 1.0 + 0.1 * jax.random.normal(k1, (c,), jnp.float32)
        beta = 0.1 * jax.random.normal(k2, (c,), jnp.float32)
        mean = 0.1 * jax.random.normal(k3, (c,), jnp.float32)
        var = 1.0 + 0.1 * jax.random.uniform(k4, (c,), jnp.float32)
        scale = gamma * lax.rsqrt(var + 1e-5)
        bias = beta - mean * scale
        return scale.reshape(1, c), bias.reshape(1, c)

    a25 = jnp.full((1, 1), 0.25, jnp.float32)   # PReLU default init
    p = {}
    p['w_main'] = 0.2 * jax.random.normal(ks[0], (Cin, Cout), jnp.float32)
    p['s_main'], p['b_main'] = bn(ks[1], Cout)
    p['a_main'] = a25
    p['w_ext1'] = 0.2 * jax.random.normal(ks[2], (Cin, Ci), jnp.float32)
    p['s_ext1'], p['b_ext1'] = bn(ks[3], Ci)
    p['a_ext1'] = a25
    p['w_ext2'] = 0.2 * jax.random.normal(ks[4], (Ci, Ci, 3, 3), jnp.float32)
    p['s_ext2'], p['b_ext2'] = bn(ks[5], Ci)
    p['a_ext2'] = a25
    p['w_ext3'] = 0.2 * jax.random.normal(ks[6], (Ci, Cout), jnp.float32)
    p['s_ext3'], p['b_ext3'] = bn(ks[7], Cout)
    p['a_ext3'] = a25
    p['a_out'] = a25
    return p


# --------------------------------------------------------------------------
# Pure-JAX reference (independent paths: XLA dilated conv + scatter unpool)
# --------------------------------------------------------------------------
def _prelu(x, a):
    return jnp.where(x > 0, x, a.reshape(()) * x)


def ref_forward(x_nchw, idx_nchw, p):
    Nb, Cin, H, W = x_nchw.shape
    hp = lax.Precision.HIGHEST
    x = jnp.transpose(x_nchw, (0, 2, 3, 1)).astype(jnp.float32)
    idx = jnp.transpose(idx_nchw, (0, 2, 3, 1)).astype(jnp.int32)

    main = _prelu(jnp.einsum('nhwc,cd->nhwd', x, p['w_main'], precision=hp)
                  * p['s_main'] + p['b_main'], p['a_main'])
    Co = main.shape[-1]
    out_flat = jnp.zeros((Nb, 2 * H * 2 * W, Co), jnp.float32)
    nn = jnp.arange(Nb)[:, None, None]
    cc = jnp.arange(Co)[None, None, :]
    main_up = out_flat.at[nn, idx.reshape(Nb, H * W, Co), cc].set(
        main.reshape(Nb, H * W, Co)).reshape(Nb, 2 * H, 2 * W, Co)

    ext = _prelu(jnp.einsum('nhwc,cd->nhwd', x, p['w_ext1'], precision=hp)
                 * p['s_ext1'] + p['b_ext1'], p['a_ext1'])
    w_conv = jnp.flip(p['w_ext2'], axis=(2, 3)).transpose(2, 3, 0, 1)  # HWIO
    ext = lax.conv_general_dilated(ext, w_conv, window_strides=(1, 1),
                                   padding=[(1, 2), (1, 2)], lhs_dilation=(2, 2),
                                   dimension_numbers=('NHWC', 'HWIO', 'NHWC'),
                                   precision=hp)
    ext = _prelu(ext * p['s_ext2'] + p['b_ext2'], p['a_ext2'])
    ext = _prelu(jnp.einsum('nhwc,cd->nhwd', ext, p['w_ext3'], precision=hp)
                 * p['s_ext3'] + p['b_ext3'], p['a_ext3'])
    out = _prelu(main_up + ext, p['a_out'])
    return jnp.transpose(out, (0, 3, 1, 2))


if __name__ == "__main__":
    Nb, Cin, Cout, H, W = 2, 16, 8, 8, 8
    key = jax.random.PRNGKey(0)
    kx, kdh, kdw, kp = jax.random.split(key, 4)

    x = jax.random.normal(kx, (Nb, Cin, H, W), jnp.float32)
    # max_indices: per (n, c, h, w), flat index into the 2H x 2W unpooled map,
    # inside the corresponding 2x2 window (as MaxPool2d(2, return_indices=True)
    # yields).
    dh = jax.random.randint(kdh, (Nb, Cout, H, W), 0, 2, jnp.int32)
    dw = jax.random.randint(kdw, (Nb, Cout, H, W), 0, 2, jnp.int32)
    hh = jnp.arange(H, dtype=jnp.int32)[None, None, :, None]
    ww = jnp.arange(W, dtype=jnp.int32)[None, None, None, :]
    max_indices = (2 * hh + dh) * (2 * W) + (2 * ww + dw)

    params = make_params(kp, Cin, Cout)

    fwd = jax.jit(upsampling_bottleneck_forward)
    out = fwd(x, max_indices, params)
    out = jax.block_until_ready(out)

    assert out.shape == (Nb, Cout, 2 * H, 2 * W), out.shape
    assert bool(jnp.all(jnp.isfinite(out)))

    ref = ref_forward(x, max_indices, params)
    assert jnp.allclose(out, ref, rtol=2e-3, atol=2e-3), \
        float(jnp.max(jnp.abs(out - ref)))

    print("KERNEL_OK")
</pallas_src>

<mosaic_0001>
module attributes {stable_mosaic.version = 11 : i64} {
  func.func @_upsampling_bottleneck_kernel(%arg0: i32, %arg1: memref<1x8xf32, #tpu.memory_space<smem>>, %arg2: memref<1x64x16xf32, #tpu.memory_space<vmem>>, %arg3: memref<1x8x8x8xi32, #tpu.memory_space<vmem>>, %arg4: memref<16x12xf32, #tpu.memory_space<vmem>>, %arg5: memref<1x8xf32, #tpu.memory_space<vmem>>, %arg6: memref<1x4xf32, #tpu.memory_space<vmem>>, %arg7: memref<16x16xf32, #tpu.memory_space<vmem>>, %arg8: memref<1x16xf32, #tpu.memory_space<vmem>>, %arg9: memref<16x32xf32, #tpu.memory_space<vmem>>, %arg10: memref<1x32xf32, #tpu.memory_space<vmem>>, %arg11: memref<1x8x2x8x16xf32, #tpu.memory_space<vmem>>, %arg12: memref<9x9x4xf32, #tpu.memory_space<vmem>>) attributes {dimension_semantics = [#tpu.dimension_semantics<parallel>], iteration_bounds = array<i64: 2>, scalar_prefetch = 0 : i64, scratch_operands = 1 : i64, tpu.core_type = #tpu.core_type<tc>, window_params = [{transform_indices = @transform_0, window_bounds = array<i64: 1, 8>}, {transform_indices = @transform_1, window_bounds = array<i64: 1, 64, 16>}, {transform_indices = @transform_2, window_bounds = array<i64: 1, 8, 8, 8>}, {pipeline_mode = #tpu.pipeline_mode<synchronous>, transform_indices = @transform_3, window_bounds = array<i64: 16, 12>}, {pipeline_mode = #tpu.pipeline_mode<synchronous>, transform_indices = @transform_4, window_bounds = array<i64: 1, 8>}, {pipeline_mode = #tpu.pipeline_mode<synchronous>, transform_indices = @transform_5, window_bounds = array<i64: 1, 4>}, {pipeline_mode = #tpu.pipeline_mode<synchronous>, transform_indices = @transform_6, window_bounds = array<i64: 16, 16>}, {pipeline_mode = #tpu.pipeline_mode<synchronous>, transform_indices = @transform_7, window_bounds = array<i64: 1, 16>}, {pipeline_mode = #tpu.pipeline_mode<synchronous>, transform_indices = @transform_8, window_bounds = array<i64: 16, 32>}, {pipeline_mode = #tpu.pipeline_mode<synchronous>, transform_indices = @transform_9, window_bounds = array<i64: 1, 32>}, {transform_indices = @transform_10, window_bounds = array<i64: 1, 8, 2, 8, 16>}]} {
    %c0 = arith.constant 0 : index
    %c0_0 = arith.constant 0 : index
    %0 = memref.load %arg1[%c0, %c0_0] : memref<1x8xf32, #tpu.memory_space<smem>>
    %c0_1 = arith.constant 0 : index
    %c1 = arith.constant 1 : index
    %1 = memref.load %arg1[%c0_1, %c1] : memref<1x8xf32, #tpu.memory_space<smem>>
    %c0_2 = arith.constant 0 : index
    %c2 = arith.constant 2 : index
    %2 = memref.load %arg1[%c0_2, %c2] : memref<1x8xf32, #tpu.memory_space<smem>>
    %c0_3 = arith.constant 0 : index
    %c3 = arith.constant 3 : index
    %3 = memref.load %arg1[%c0_3, %c3] : memref<1x8xf32, #tpu.memory_space<smem>>
    %c0_4 = arith.constant 0 : index
    %c4 = arith.constant 4 : index
    %4 = memref.load %arg1[%c0_4, %c4] : memref<1x8xf32, #tpu.memory_space<smem>>
    %c0_5 = arith.constant 0 : index
    %c0_6 = arith.constant 0 : index
    %c0_7 = arith.constant 0 : index
    %5 = vector.load %arg2[%c0_5, %c0_6, %c0_7] : memref<1x64x16xf32, #tpu.memory_space<vmem>>, vector<1x64x16xf32>
    %6 = vector.shape_cast %5 : vector<1x64x16xf32> to vector<64x16xf32>
    %c0_8 = arith.constant 0 : index
    %c0_9 = arith.constant 0 : index
    %7 = vector.load %arg4[%c0_8, %c0_9] : memref<16x12xf32, #tpu.memory_space<vmem>>, vector<16x12xf32>
    %cst = arith.constant dense<0.000000e+00> : vector<64x12xf32>
    %8 = tpu.matmul %6, %7, %cst {dimension_numbers = #tpu.dot_dimension_numbers<[1], [0], [0], [1], [0, 0, 1, 1], [], []>} : vector<64x16xf32>, vector<16x12xf32>, vector<64x12xf32> -> vector<64x12xf32>
    %9 = vector.extract_strided_slice %8 {offsets = [0, 0], sizes = [64, 8], strides = [1, 1]} : vector<64x12xf32> to vector<64x8xf32>
    %c0_10 = arith.constant 0 : index
    %c0_11 = arith.constant 0 : index
    %10 = vector.load %arg5[%c0_10, %c0_11] : memref<1x8xf32, #tpu.memory_space<vmem>>, vector<1x8xf32>
    %11 = vector.broadcast %10 : vector<1x8xf32> to vector<64x8xf32>
    %12 = arith.addf %9, %11 : vector<64x8xf32>
    %cst_12 = arith.constant 0.000000e+00 : f32
    %13 = vector.broadcast %cst_12 : f32 to vector<64x8xf32>
    %14 = arith.cmpf ogt, %12, %13 : vector<64x8xf32>
    %15 = vector.broadcast %0 : f32 to vector<64x8xf32>
    %16 = arith.mulf %15, %12 : vector<64x8xf32>
    %17 = arith.select %14, %12, %16 : vector<64x8xi1>, vector<64x8xf32>
    %18 = vector.extract_strided_slice %8 {offsets = [0, 8], sizes = [64, 4], strides = [1, 1]} : vector<64x12xf32> to vector<64x4xf32>
    %c0_13 = arith.constant 0 : index
    %c0_14 = arith.constant 0 : index
    %19 = vector.load %arg6[%c0_13, %c0_14] : memref<1x4xf32, #tpu.memory_space<vmem>>, vector<1x4xf32>
    %20 = vector.broadcast %19 : vector<1x4xf32> to vector<64x4xf32>
    %21 = arith.addf %18, %20 : vector<64x4xf32>
    %cst_15 = arith.constant 0.000000e+00 : f32
    %22 = vector.broadcast %cst_15 : f32 to vector<64x4xf32>
    %23 = arith.cmpf ogt, %21, %22 : vector<64x4xf32>
    %24 = vector.broadcast %1 : f32 to vector<64x4xf32>
    %25 = arith.mulf %24, %21 : vector<64x4xf32>
    %26 = arith.select %23, %21, %25 : vector<64x4xi1>, vector<64x4xf32>
    %cst_16 = arith.constant 0.000000e+00 : f32
    %27 = vector.broadcast %cst_16 : f32 to vector<9x9x4xf32>
    %c0_17 = arith.constant 0 : index
    %c0_18 = arith.constant 0 : index
    %c0_19 = arith.constant 0 : index
    %28 = vector.load %arg12[%c0_17, %c0_18, %c0_19] : memref<9x9x4xf32, #tpu.memory_space<vmem>>, vector<9x9x4xf32>
    tpu.vector_store %arg12[%c0_17, %c0_18, %c0_19], %27 {strides = array<i32>} : memref<9x9x4xf32, #tpu.memory_space<vmem>>, vector<9x9x4xf32>,
    %29 = vector.shape_cast %26 : vector<64x4xf32> to vector<8x8x4xf32>
    %c0_20 = arith.constant 0 : index
    %c0_21 = arith.constant 0 : index
    %c0_22 = arith.constant 0 : index
    %30 = vector.load %arg12[%c0_20, %c0_21, %c0_22] : memref<9x9x4xf32, #tpu.memory_space<vmem>>, vector<8x8x4xf32>
    tpu.vector_store %arg12[%c0_20, %c0_21, %c0_22], %29 {strides = array<i32>} : memref<9x9x4xf32, #tpu.memory_space<vmem>>, vector<8x8x4xf32>,
    %c0_23 = arith.constant 0 : index
    %c1_24 = arith.constant 1 : index
    %c0_25 = arith.constant 0 : index
    %31 = vector.load %arg12[%c0_23, %c1_24, %c0_25] : memref<9x9x4xf32, #tpu.memory_space<vmem>>, vector<8x8x4xf32>
    %32 = vector.shape_cast %31 : vector<8x8x4xf32> to vector<64x4xf32>
    %c1_26 = arith.constant 1 : index
    %c0_27 = arith.constant 0 : index
    %c0_28 = arith.constant 0 : index
    %33 = vector.load %arg12[%c1_26, %c0_27, %c0_28] : memref<9x9x4xf32, #tpu.memory_space<vmem>>, vector<8x8x4xf32>
    %34 = vector.shape_cast %33 : vector<8x8x4xf32> to vector<64x4xf32>
    %c1_29 = arith.constant 1 : index
    %c1_30 = arith.constant 1 : index
    %c0_31 = arith.constant 0 : index
    %35 = vector.load %arg12[%c1_29, %c1_30, %c0_31] : memref<9x9x4xf32, #tpu.memory_space<vmem>>, vector<8x8x4xf32>
    %36 = vector.shape_cast %35 : vector<8x8x4xf32> to vector<64x4xf32>
    %37 = tpu.concatenate %26, %32, %34, %36 in 1 : vector<64x4xf32>, vector<64x4xf32>, vector<64x4xf32>, vector<64x4xf32> -> vector<64x16xf32>
    %c0_32 = arith.constant 0 : index
    %c0_33 = arith.constant 0 : index
    %38 = vector.load %arg7[%c0_32, %c0_33] : memref<16x16xf32, #tpu.memory_space<vmem>>, vector<16x16xf32>
    %cst_34 = arith.constant dense<0.000000e+00> : vector<64x16xf32>
    %39 = tpu.matmul %37, %38, %cst_34 {dimension_numbers = #tpu.dot_dimension_numbers<[1], [0], [0], [1], [0, 0, 1, 1], [], []>} : vector<64x16xf32>, vector<16x16xf32>, vector<64x16xf32> -> vector<64x16xf32>
    %c0_35 = arith.constant 0 : index
    %c0_36 = arith.constant 0 : index
    %40 = vector.load %arg8[%c0_35, %c0_36] : memref<1x16xf32, #tpu.memory_space<vmem>>, vector<1x16xf32>
    %41 = vector.broadcast %40 : vector<1x16xf32> to vector<64x16xf32>
    %42 = arith.addf %39, %41 : vector<64x16xf32>
    %cst_37 = arith.constant 0.000000e+00 : f32
    %43 = vector.broadcast %cst_37 : f32 to vector<64x16xf32>
    %44 = arith.cmpf ogt, %42, %43 : vector<64x16xf32>
    %45 = vector.broadcast %2 : f32 to vector<64x16xf32>
    %46 = arith.mulf %45, %42 : vector<64x16xf32>
    %47 = arith.select %44, %42, %46 : vector<64x16xi1>, vector<64x16xf32>
    %c0_38 = arith.constant 0 : index
    %c0_39 = arith.constant 0 : index
    %48 = vector.load %arg9[%c0_38, %c0_39] : memref<16x32xf32, #tpu.memory_space<vmem>>, vector<16x32xf32>
    %cst_40 = arith.constant dense<0.000000e+00> : vector<64x32xf32>
    %49 = tpu.matmul %47, %48, %cst_40 {dimension_numbers = #tpu.dot_dimension_numbers<[1], [0], [0], [1], [0, 0, 1, 1], [], []>} : vector<64x16xf32>, vector<16x32xf32>, vector<64x32xf32> -> vector<64x32xf32>
    %c0_41 = arith.constant 0 : index
    %c0_42 = arith.constant 0 : index
    %50 = vector.load %arg10[%c0_41, %c0_42] : memref<1x32xf32, #tpu.memory_space<vmem>>, vector<1x32xf32>
    %51 = vector.broadcast %50 : vector<1x32xf32> to vector<64x32xf32>
    %52 = arith.addf %49, %51 : vector<64x32xf32>
    %cst_43 = arith.constant 0.000000e+00 : f32
    %53 = vector.broadcast %cst_43 : f32 to vector<64x32xf32>
    %54 = arith.cmpf ogt, %52, %53 : vector<64x32xf32>
    %55 = vector.broadcast %3 : f32 to vector<64x32xf32>
    %56 = arith.mulf %55, %52 : vector<64x32xf32>
    %57 = arith.select %54, %52, %56 : vector<64x32xi1>, vector<64x32xf32>
    %c0_44 = arith.constant 0 : index
    %c0_45 = arith.constant 0 : index
    %c0_46 = arith.constant 0 : index
    %c0_47 = arith.constant 0 : index
    %58 = vector.load %arg3[%c0_44, %c0_45, %c0_46, %c0_47] : memref<1x8x8x8xi32, #tpu.memory_space<vmem>>, vector<1x8x8x8xi32>
    %59 = vector.shape_cast %58 : vector<1x8x8x8xi32> to vector<8x8x8xi32>
    %c4_i32 = arith.constant 4 : i32
    %60 = vector.broadcast %c4_i32 : i32 to vector<8x8x8xi32>
    %61 = arith.shrsi %59, %60 : vector<8x8x8xi32>
    %c1_i32 = arith.constant 1 : i32
    %62 = vector.broadcast %c1_i32 : i32 to vector<8x8x8xi32>
    %63 = arith.andi %61, %62 : vector<8x8x8xi32>
    %c2_i32 = arith.constant 2 : i32
    %64 = vector.broadcast %c2_i32 : i32 to vector<8x8x8xi32>
    %65 = arith.muli %64, %63 : vector<8x8x8xi32>
    %c1_i32_48 = arith.constant 1 : i32
    %66 = vector.broadcast %c1_i32_48 : i32 to vector<8x8x8xi32>
    %67 = arith.andi %59, %66 : vector<8x8x8xi32>
    %68 = arith.addi %65, %67 : vector<8x8x8xi32>
    %69 = vector.shape_cast %17 : vector<64x8xf32> to vector<8x8x8xf32>
    %70 = tpu.concatenate %69, %69 in 2 : vector<8x8x8xf32>, vector<8x8x8xf32> -> vector<8x8x16xf32>
    %c1_i32_49 = arith.constant 1 : i32
    %71 = vector.broadcast %c1_i32_49 : i32 to vector<8x8x8xi32>
    %72 = arith.subi %68, %71 : vector<8x8x8xi32>
    %73 = tpu.concatenate %68, %72 in 2 : vector<8x8x8xi32>, vector<8x8x8xi32> -> vector<8x8x16xi32>
    %74 = vector.extract_strided_slice %57 {offsets = [0, 0], sizes = [64, 16], strides = [1, 1]} : vector<64x32xf32> to vector<64x16xf32>
    %75 = vector.shape_cast %74 : vector<64x16xf32> to vector<8x8x16xf32>
    %c0_i32 = arith.constant 0 : i32
    %76 = vector.broadcast %c0_i32 : i32 to vector<8x8x16xi32>
    %77 = arith.cmpi eq, %73, %76 : vector<8x8x16xi32>
    %cst_50 = arith.constant 0.000000e+00 : f32
    %78 = vector.broadcast %cst_50 : f32 to vector<8x8x16xf32>
    %79 = arith.select %77, %70, %78 : vector<8x8x16xi1>, vector<8x8x16xf32>
    %80 = arith.addf %79, %75 : vector<8x8x16xf32>
    %cst_51 = arith.constant 0.000000e+00 : f32
    %81 = vector.broadcast %cst_51 : f32 to vector<8x8x16xf32>
    %82 = arith.cmpf ogt, %80, %81 : vector<8x8x16xf32>
    %83 = vector.broadcast %4 : f32 to vector<8x8x16xf32>
    %84 = arith.mulf %83, %80 : vector<8x8x16xf32>
    %85 = arith.select %82, %80, %84 : vector<8x8x16xi1>, vector<8x8x16xf32>
    %c0_52 = arith.constant 0 : index
    %c0_53 = arith.constant 0 : index
    %c0_54 = arith.constant 0 : index
    %c0_55 = arith.constant 0 : index
    %c0_56 = arith.constant 0 : index
    %86 = vector.load %arg11[%c0_52, %c0_53, %c0_54, %c0_55, %c0_56] : memref<1x8x2x8x16xf32, #tpu.memory_space<vmem>>, vector<1x8x1x8x16xf32>
    %87 = vector.shape_cast %86 : vector<1x8x1x8x16xf32> to vector<8x8x16xf32>
    %88 = vector.shape_cast %85 : vector<8x8x16xf32> to vector<1x8x1x8x16xf32>
    tpu.vector_store %arg11[%c0_52, %c0_53, %c0_54, %c0_55, %c0_56], %88 {strides = array<i32>} : memref<1x8x2x8x16xf32, #tpu.memory_space<vmem>>, vector<1x8x1x8x16xf32>,
    %89 = vector.extract_strided_slice %57 {offsets = [0, 16], sizes = [64, 16], strides = [1, 1]} : vector<64x32xf32> to vector<64x16xf32>
    %90 = vector.shape_cast %89 : vector<64x16xf32> to vector<8x8x16xf32>
    %c2_i32_57 = arith.constant 2 : i32
    %91 = vector.broadcast %c2_i32_57 : i32 to vector<8x8x16xi32>
    %92 = arith.cmpi eq, %73, %91 : vector<8x8x16xi32>
    %cst_58 = arith.constant 0.000000e+00 : f32
    %93 = vector.broadcast %cst_58 : f32 to vector<8x8x16xf32>
    %94 = arith.select %92, %70, %93 : vector<8x8x16xi1>, vector<8x8x16xf32>
    %95 = arith.addf %94, %90 : vector<8x8x16xf32>
    %cst_59 = arith.constant 0.000000e+00 : f32
    %96 = vector.broadcast %cst_59 : f32 to vector<8x8x16xf32>
    %97 = arith.cmpf ogt, %95, %96 : vector<8x8x16xf32>
    %98 = vector.broadcast %4 : f32 to vector<8x8x16xf32>
    %99 = arith.mulf %98, %95 : vector<8x8x16xf32>
    %100 = arith.select %97, %95, %99 : vector<8x8x16xi1>, vector<8x8x16xf32>
    %c0_60 = arith.constant 0 : index
    %c0_61 = arith.constant 0 : index
    %c1_62 = arith.constant 1 : index
    %c0_63 = arith.constant 0 : index
    %c0_64 = arith.constant 0 : index
    %101 = vector.load %arg11[%c0_60, %c0_61, %c1_62, %c0_63, %c0_64] : memref<1x8x2x8x16xf32, #tpu.memory_space<vmem>>, vector<1x8x1x8x16xf32>
    %102 = vector.shape_cast %101 : vector<1x8x1x8x16xf32> to vector<8x8x16xf32>
    %103 = vector.shape_cast %100 : vector<8x8x16xf32> to vector<1x8x1x8x16xf32>
    tpu.vector_store %arg11[%c0_60, %c0_61, %c1_62, %c0_63, %c0_64], %103 {strides = array<i32>} : memref<1x8x2x8x16xf32, #tpu.memory_space<vmem>>, vector<1x8x1x8x16xf32>,
    return
  }
  func.func @transform_0(%arg0: i32) -> (i32, i32) {
    %c0_i32 = arith.constant 0 : i32
    %c0_i32_0 = arith.constant 0 : i32
    %c0_i32_1 = arith.constant 0 : i32
    return %c0_i32, %c0_i32_0 : i32, i32
  }
  func.func @transform_1(%arg0: i32) -> (i32, i32, i32) {
    %c0_i32 = arith.constant 0 : i32
    %c0_i32_0 = arith.constant 0 : i32
    %c0_i32_1 = arith.constant 0 : i32
    return %arg0, %c0_i32, %c0_i32_0 : i32, i32, i32
  }
  func.func @transform_2(%arg0: i32) -> (i32, i32, i32, i32) {
    %c0_i32 = arith.constant 0 : i32
    %c0_i32_0 = arith.constant 0 : i32
    %c0_i32_1 = arith.constant 0 : i32
    %c0_i32_2 = arith.constant 0 : i32
    return %arg0, %c0_i32, %c0_i32_0, %c0_i32_1 : i32, i32, i32, i32
  }
  func.func @transform_3(%arg0: i32) -> (i32, i32) {
    %c0_i32 = arith.constant 0 : i32
    %c0_i32_0 = arith.constant 0 : i32
    %c0_i32_1 = arith.constant 0 : i32
    return %c0_i32, %c0_i32_0 : i32, i32
  }
  func.func @transform_4(%arg0: i32) -> (i32, i32) {
    %c0_i32 = arith.constant 0 : i32
    %c0_i32_0 = arith.constant 0 : i32
    %c0_i32_1 = arith.constant 0 : i32
    return %c0_i32, %c0_i32_0 : i32, i32
  }
  func.func @transform_5(%arg0: i32) -> (i32, i32) {
    %c0_i32 = arith.constant 0 : i32
    %c0_i32_0 = arith.constant 0 : i32
    %c0_i32_1 = arith.constant 0 : i32
    return %c0_i32, %c0_i32_0 : i32, i32
  }
  func.func @transform_6(%arg0: i32) -> (i32, i32) {
    %c0_i32 = arith.constant 0 : i32
    %c0_i32_0 = arith.constant 0 : i32
    %c0_i32_1 = arith.constant 0 : i32
    return %c0_i32, %c0_i32_0 : i32, i32
  }
  func.func @transform_7(%arg0: i32) -> (i32, i32) {
    %c0_i32 = arith.constant 0 : i32
    %c0_i32_0 = arith.constant 0 : i32
    %c0_i32_1 = arith.constant 0 : i32
    return %c0_i32, %c0_i32_0 : i32, i32
  }
  func.func @transform_8(%arg0: i32) -> (i32, i32) {
    %c0_i32 = arith.constant 0 : i32
    %c0_i32_0 = arith.constant 0 : i32
    %c0_i32_1 = arith.constant 0 : i32
    return %c0_i32, %c0_i32_0 : i32, i32
  }
  func.func @transform_9(%arg0: i32) -> (i32, i32) {
    %c0_i32 = arith.constant 0 : i32
    %c0_i32_0 = arith.constant 0 : i32
    %c0_i32_1 = arith.constant 0 : i32
    return %c0_i32, %c0_i32_0 : i32, i32
  }
  func.func @transform_10(%arg0: i32) -> (i32, i32, i32, i32, i32) {
    %c0_i32 = arith.constant 0 : i32
    %c0_i32_0 = arith.constant 0 : i32
    %c0_i32_1 = arith.constant 0 : i32
    %c0_i32_2 = arith.constant 0 : i32
    %c0_i32_3 = arith.constant 0 : i32
    return %arg0, %c0_i32, %c0_i32_0, %c0_i32_1, %c0_i32_2 : i32, i32, i32, i32, i32
  }
}

</mosaic_0001>

<bundles_post_ra>
// kernel: upsampling_bottleneck_forward.1
= control target key start
LH: loop header
LB: loop body
LE: loop exit
PB: predicated region body
PF: predicated region fallthrough
CT: control target
= control target key end

     0   :  { %15 = vsyncpa [#allocation4], 0  ;;  %s1771_s13 = smov 0   ;;  %s2283_s0 = inlined_call_operand.vmem [shape: f32[1,8], index: 0, kind: input, shape index: {}]   ;;  %s2284_s1 = inlined_call_operand.vmem [shape: f32[2,64,16], index: 1, kind: input, shape index: {}]   ;;  %s2285_s2 = inlined_call_operand.vmem [shape: s32[2,8,8,8], index: 2, kind: input, shape index: {}]   ;;  %s2286_s3 = inlined_call_operand.vmem [shape: f32[16,12], index: 3, kind: input, shape index: {}]   ;;  %s2287_s4 = inlined_call_operand.vmem [shape: f32[1,8], index: 4, kind: input, shape index: {}]   ;;  %s2288_s5 = inlined_call_operand.vmem [shape: f32[1,4], index: 5, kind: input, shape index: {}]   ;;  %s2289_s6 = inlined_call_operand.vmem [shape: f32[16,16], index: 6, kind: input, shape index: {}]   ;;  %s2290_s7 = inlined_call_operand.vmem [shape: f32[1,16], index: 7, kind: input, shape index: {}]   ;;  %s2291_s8 = inlined_call_operand.vmem [shape: f32[16,32], index: 8, kind: input, shape index: {}]   ;;  %s2292_s9 = inlined_call_operand.vmem [shape: f32[1,32], index: 9, kind: input, shape index: {}]   ;;  %s2293_s10 = inlined_call_operand.vmem [shape: f32[2,8,2,8,16], index: 10, kind: output, shape index: {}]  }
   0x1 LB: > { %s1777_s14 = sadd.s32 4294967295, %s1707_s13   ;;  %p1501_p0 = scmp.ge.s32.totalorder %s1707_s13, 1  ;;  %s1707_s13 = sphi %s1771_s13, %s21_s13  }
   0x2   : > { %p272_p1 = scmp.lt.s32.totalorder %s1707_s13, 3  ;;  %s285_s17 = sshll.u32 %s2283_s0, 4  ;;  %s286_s17 = int_to_ptr.vmem [resolvable:$true] %s285_s17 }
   0x3   : > { %p1665_p3 = scmp.eq.s32.totalorder %s1777_s14, 0  ;;  %s1682_s19 = scalar_lea.vmem %s286_s17, 16 }
   0x4   : > { %p1784_p2 = pnand %p1501_p0, %p272_p1  ;;  %p1683_p6 = scmp.ne.s32.totalorder %s286_s17, %s1682_s19 }
   0x5   : > { %p1690_p10 = scmp.lt.s32.totalorder %s286_s17, %s286_s17  ;;  %p1691_p11 = scmp.lt.s32.totalorder %s1682_s19, %s1682_s19 }
   0x6   : > { %p1661_p4 = pneg %p1784_p2 }
   0x7   : > { %p1692_p12 = por %p1691_p11, %p1690_p10 }
   0x8   : > { %p1662_p5 = pnand %p1665_p3, %p1661_p4 }
   0xa   : > { %p1684_p7 = pneg %p1662_p5 }
   0xc   : > { %p1685_p8 = pnand %p1684_p7, %p1683_p6 }
   0xe   : > { %p1686_p9 = pneg %p1685_p8 }
  0x10   : > { %p1693_p13 = pnand %p1692_p12, %p1686_p9 }
  0x12   : > { %1696 = shalt.err (!%p1693_p13)
}
  0x13   : > { %s1709_s20 = smov [#allocation3]   ;;  %335 = sbr.rel (%p1784_p2) target bundleno = 1099 (0x44b), region = 60 }
  0x14   : > { %1664 = dma.vmem_to_smem (!%p1662_p5), %s286_s17, 16, %s1709_s20, [#allocation4]  }
  0x1a   : > { %1702 = dma.done.wait (%p1665_p3), [#allocation4], 16  }
  0x1b   : > { %1704 = vsyncadd (%p1665_p3), [#allocation4], 4294967280 }
  0x1c   : > { %341 = sfence }
  0x1d   : > { %v407_v0 = vld [vmem:[%s2286_s3] sm:$0xff]  ;;  %v408_v1 = vld [vmem:[%s2286_s3 + $0x8] sm:$0xff]  ;;  %p379_p0 = scmp.lt.s32.totalorder %s1777_s14, 1  ;;  %s1710_s27 = smov 8   ;;  %vm409_vm0 = vcmask 130048   ;;  %vm621_vm1 = vcmask 31744  }
  0x1e   : > { %v1525_v2 = vld [vmem:[%s2288_s5] ss:$0 sm:$0xff]  ;;  %v1643_v3 = vpack.c.bf16 %v408_v1, %v407_v0  ;;  %v1711_v12 = vmov 0.0   ;;  %s1512_s12 = sld [smem:[#allocation3 + $0x1]]  ;;  %vm623_vm2 = vcmask 24576   ;;  %s1712_s15 = smov 120  }
  0x1f   : > { %s2296_s14 = smov (!%p379_p0, %s1777_s14), 1  ;;  %585 = vrot.lane.b32.xlu0 %v1525_v2, %s1710_s27  ;;  %625 = vst.msk [vmem:[#allocation2 + $0x10] sm:$0xff] %vm621_vm1, %v1711_v12  ;;  %622 = vst.msk [vmem:[#allocation2] sm:$0xff] %vm621_vm1, %v1711_v12  ;;  %s1713_s16 = smov 4   ;;  %v828_v62 = vld [vmem:[%s2289_s6] sm:$0xff]  ;;  %v829_v63 = vld [vmem:[%s2289_s6 + $0x8] sm:$0xff] }
  0x20   : > { %1644 = vmatprep.subr.bf16.mxu0 %v1643_v3  ;;  %1655 = vmatprep.subr.bf16.mxu1 %v1643_v3  ;;  %s1562_s28 = sshll.u32 %s2296_s14, 6  ;;  %627 = vst.msk [vmem:[#allocation2 + $0x20] sm:$0xff] %vm621_vm1, %v1711_v12  ;;  %629 = vst.msk [vmem:[#allocation2 + $0x30] sm:$0xff] %vm621_vm1, %v1711_v12  ;;  %s1714_s17 = smov 12   ;;  %v1647_v0 = vpack.c.bf16 %v829_v63, %v828_v62 }
  0x21   : > { %1646 = vmatpush3.bf16.msra.mxu0 %v1643_v3  ;;  %1656 = vmatpush3.bf16.msra.mxu1 %v1643_v3  ;;  %s383_s11 = scalar_lea.vmem %s2284_s1, %s1562_s28  ;;  %631 = vst.msk [vmem:[#allocation2 + $0x40] sm:$0xff] %vm621_vm1, %v1711_v12  ;;  %633 = vst.msk [vmem:[#allocation2 + $0x50] sm:$0xff] %vm621_vm1, %v1711_v12  ;;  %s1914_s24 = scalar_lea.vmem %s2285_s2, %s1562_s28 }
  0x22   : > { %v399_v4 = vld [vmem:[%s383_s11] sm:$0xff]  ;;  %v400_v6 = vld [vmem:[%s383_s11 + $0x8] sm:$0xff]  ;;  %v401_v8 = vld [vmem:[%s383_s11 + $0x10] sm:$0xff]  ;;  %635 = vst.msk [vmem:[#allocation2 + $0x60] sm:$0xff] %vm621_vm1, %v1711_v12  ;;  %1648 = vmatprep.subr.bf16.mxu1 %v1647_v0  ;;  %s394_s25 = sld [smem:[#allocation3]]  ;;  %s1515_s18 = sld [smem:[#allocation3 + $0x4]] }
  0x23   : > { %v403_v5 = vld [vmem:[%s383_s11 + $0x20] sm:$0xff]  ;;  %1599 = vmatprep.mubr.msk.f32.mxu0 %vm409_vm0, %v399_v4  ;;  %v404_v7 = vld [vmem:[%s383_s11 + $0x28] sm:$0xff]  ;;  %v405_v9 = vld [vmem:[%s383_s11 + $0x30] sm:$0xff]  ;;  %637 = vst.msk [vmem:[#allocation2 + $0x70] sm:$0xff] %vm621_vm1, %v1711_v12  ;;  %s1564_s21 = sshll.u32 %s2296_s14, 7  ;;  %s1715_s22 = smov 112  }
  0x24   : > { %1605 = vmatprep.mubr.msk.f32.mxu1 %vm409_vm0, %v403_v5  ;;  %1600 = vmatmul.mubr.msk.f32.vlgmr.msra.gmra.mrb[0].mxu0 %vm409_vm0, %v400_v6  ;;  %v402_v10 = vld [vmem:[%s383_s11 + $0x18] sm:$0xff]  ;;  %639 = vst.msk [vmem:[#allocation2 + $0x80] sm:$0xff] %vm621_vm1, %v1711_v12  ;;  %v604_v16 = vstv %s1512_s12  ;;  %v1154_v4 = vld [vmem:[%s1914_s24] sm:$0xff]  ;;  %v1155_v6 = vld [vmem:[%s1914_s24 + $0x8] sm:$0xff]  ;;  %s1513_s12 = sld [smem:[#allocation3 + $0x2]] }
  0x25   : > { %1606 = vmatmul.mubr.msk.f32.vlgmr.msra.gmra.mrb[0].mxu1 %vm409_vm0, %v404_v7  ;;  %1602 = vmatprep.mubr.msk.f32.mxu0 %vm409_vm0, %v401_v8  ;;  %v406_v11 = vld [vmem:[%s383_s11 + $0x38] sm:$0xff]  ;;  %626 = vst.msk [vmem:[#allocation2 + $0x18] sm:$0x1] %vm623_vm2, %v1711_v12  ;;  %624 = vst.msk [vmem:[#allocation2 + $0x8] sm:$0x1] %vm623_vm2, %v1711_v12  ;;  %v1156_v7 = vld [vmem:[%s1914_s24 + $0x10] sm:$0xff] }
  0x26   : > { %1608 = vmatprep.mubr.msk.f32.mxu1 %vm409_vm0, %v405_v9  ;;  %628 = vst.msk [vmem:[#allocation2 + $0x28] sm:$0x1] %vm623_vm2, %v1711_v12  ;;  %630 = vst.msk [vmem:[#allocation2 + $0x38] sm:$0x1] %vm623_vm2, %v1711_v12  ;;  %1650 = vmatpush3.bf16.msra.mxu1 %v1647_v0  ;;  %v1162_v8 = vshra.s32 %v1154_v4, 4  ;;  %v1163_v9 = vshra.s32 %v1155_v6, 4 }
  0x27   : > { %632 = vst.msk [vmem:[#allocation2 + $0x48] sm:$0x1] %vm623_vm2, %v1711_v12  ;;  %634 = vst.msk [vmem:[#allocation2 + $0x58] sm:$0x1] %vm623_vm2, %v1711_v12 }
  0x28   : > { %1603 = vmatmul.mubr.msk.f32.gmra.mrb[2].mxu0 %vm409_vm0, %v402_v10  ;;  %636 = vst.msk [vmem:[#allocation2 + $0x68] sm:$0x1] %vm623_vm2, %v1711_v12  ;;  %638 = vst.msk [vmem:[#allocation2 + $0x78] sm:$0x1] %vm623_vm2, %v1711_v12  ;;  %v1164_v10 = vshra.s32 %v1156_v7, 4 }
  0x29   : > { %1609 = vmatmul.mubr.msk.f32.gmra.mrb[2].mxu1 %vm409_vm0, %v406_v11  ;;  %640 = vst.msk [vmem:[#allocation2 + $0x88] sm:$0x1] %vm623_vm2, %v1711_v12  ;;  %v1170_v12 = vand.u32 1, %v1162_v8 }
  0x30   : > { %v705_v63 = vld [vmem:[#allocation2 + $0x81] sm:$0xff] }
  0x91   : > { %v586_v13 = vpop.permute.xlu0 %585 }
  0xf7   : > { %v1836_v14 = vpop.f32.mrb[0].mxu0 }
  0xf8   : > { %v1838_v15 = vpop.f32.mrb[0].mxu1  ;;  %v589_v17 = vadd.f32 %v1836_v14, %v586_v13  ;;  %v1841_v18 = vpop.f32.mrb[1].mxu0 }
  0xf9   : > { %v1843_v19 = vpop.f32.mrb[1].mxu1  ;;  %v588_v20 = vadd.f32 %v586_v13, %v1841_v18  ;;  %v593_v28 = vadd.f32 %v1838_v15, %v586_v13 }
  0xfa   : > { %v606_v21 = vmul.f32 %v604_v16, %v589_v17  ;;  %vm597_vm3 = vcmp.gt.f32.partialorder %v589_v17, 0.0  ;;  %v592_v29 = vadd.f32 %v586_v13, %v1843_v19 }
  0xfb   : > { %v1846_v22 = vpop.f32.mrb[2].mxu0  ;;  %vm596_vm4 = vcmp.gt.f32.partialorder %v588_v20, 0.0  ;;  %v605_v24 = vmul.f32 %v604_v16, %v588_v20  ;;  %v610_v39 = vmul.f32 %v604_v16, %v593_v28  ;;  %vm601_vm7 = vcmp.gt.f32.partialorder %v593_v28, 0.0 }
  0xfc   : > { %v1848_v23 = vpop.f32.mrb[2].mxu1  ;;  %v591_v25 = vadd.f32 %v1846_v22, %v586_v13  ;;  %v1851_v26 = vpop.f32.mrb[3].mxu0  ;;  %v614_v31 = vsel %vm597_vm3, %v589_v17, %v606_v21  ;;  %v609_v40 = vmul.f32 %v604_v16, %v592_v29  ;;  %vm600_vm8 = vcmp.gt.f32.partialorder %v592_v29, 0.0  ;;  %v697_v17 = vld [vmem:[#allocation2 + $0x80] sm:$0xff] }
  0xfd   : > { %v1853_v27 = vpop.f32.mrb[3].mxu1  ;;  %v590_v30 = vadd.f32 %v586_v13, %v1851_v26  ;;  %v613_v32 = vsel %vm596_vm4, %v588_v20, %v605_v24  ;;  %651 = vrot.lane.b32.xlu1 %v614_v31, %s1712_s15  ;;  %v595_v37 = vadd.f32 %v1848_v23, %v586_v13  ;;  %v618_v41 = vsel %vm601_vm7, %v593_v28, %v610_v39  ;;  %v1159_v31 = vld [vmem:[%s1914_s24 + $0x28] sm:$0xff] }
  0xfe   : > { %vm599_vm5 = vcmp.gt.f32.partialorder %v591_v25, 0.0  ;;  %v608_v33 = vmul.f32 %v604_v16, %v591_v25  ;;  %649 = vrot.lane.b32.xlu0 %v613_v32, %s1712_s15  ;;  %v594_v38 = vadd.f32 %v586_v13, %v1853_v27  ;;  %v617_v42 = vsel %vm600_vm8, %v592_v29, %v609_v40  ;;  %v1157_v13 = vld [vmem:[%s1914_s24 + $0x18] sm:$0xff]  ;;  %v1160_v32 = vld [vmem:[%s1914_s24 + $0x30] sm:$0xff] }
  0xff   : > { %vm598_vm6 = vcmp.gt.f32.partialorder %v590_v30, 0.0  ;;  %v607_v34 = vmul.f32 %v604_v16, %v590_v30  ;;  %v612_v43 = vmul.f32 %v604_v16, %v595_v37  ;;  %vm603_vm9 = vcmp.gt.f32.partialorder %v595_v37, 0.0 }
 0x100   : > { %v616_v35 = vsel %vm599_vm5, %v591_v25, %v608_v33  ;;  %v611_v44 = vmul.f32 %v604_v16, %v594_v38  ;;  %vm602_vm10 = vcmp.gt.f32.partialorder %v594_v38, 0.0  ;;  %v1158_v16 = vld [vmem:[%s1914_s24 + $0x20] sm:$0xff]  ;;  %v1171_v20 = vand.u32 1, %v1163_v9 }
 0x101   : > { %v615_v36 = vsel %vm598_vm6, %v590_v30, %v607_v34  ;;  %v620_v45 = vsel %vm603_vm9, %v595_v37, %v612_v43  ;;  %v1172_v21 = vand.u32 1, %v1164_v10  ;;  %v1165_v25 = vshra.s32 %v1157_v13, 4 }
 0x102   : > { %655 = vrot.lane.b32.xlu0 %v616_v35, %s1712_s15  ;;  %653 = vrot.lane.b32.xlu1 %v615_v36, %s1712_s15  ;;  %v619_v46 = vsel %vm602_vm10, %v594_v38, %v611_v44  ;;  %v1166_v28 = vshra.s32 %v1158_v16, 4  ;;  %v1178_v29 = vmul.u32 2, %v1170_v12  ;;  %v1186_v30 = vand.u32 1, %v1154_v4  ;;  %v1161_v44 = vld [vmem:[%s1914_s24 + $0x38] sm:$0xff]  ;;  %s2193_s24 = scalar_lea.vmem %s2293_s10, %s1564_s21 }
 0x103   : > { %v1179_v33 = vmul.u32 2, %v1171_v20  ;;  %v1187_v34 = vand.u32 1, %v1155_v6  ;;  %v1180_v35 = vmul.u32 2, %v1172_v21  ;;  %v1188_v36 = vand.u32 1, %v1156_v7 }
 0x104   : > { %v1173_v39 = vand.u32 1, %v1165_v25  ;;  %v1174_v40 = vand.u32 1, %v1166_v28  ;;  %v1168_v43 = vshra.s32 %v1160_v32, 4  ;;  %v1169_v62 = vshra.s32 %v1161_v44, 4 }
 0x105   : > { %v1191_v6 = vand.u32 1, %v1159_v31  ;;  %v1192_v7 = vand.u32 1, %v1160_v32  ;;  %v562_v28 = vstv %s394_s25  ;;  %vm810_vm5 = vcmask 64512  }
 0x106   : > { %659 = vrot.lane.b32.xlu0 %v618_v41, %s1712_s15  ;;  %657 = vrot.lane.b32.xlu1 %v617_v42, %s1712_s15  ;;  %v1167_v41 = vshra.s32 %v1159_v31, 4  ;;  %v1933_v42 = vadd.s32 %v1186_v30, %v1178_v29  ;;  %v1177_v8 = vand.u32 1, %v1169_v62  ;;  %vm819_vm6 = vcmask 97280  }
 0x10a   : > { %663 = vrot.lane.b32.xlu0 %v620_v45, %s1712_s15  ;;  %661 = vrot.lane.b32.xlu1 %v619_v46, %s1712_s15  ;;  %v1936_v45 = vadd.s32 %v1187_v34, %v1179_v33  ;;  %v1938_v46 = vadd.s32 %v1188_v36, %v1180_v35 }
 0x10c   : > { %v1545_v0 = vadd.s32 4294967295, %v1936_v45 }
 0x16f   : > { %v1860_v47 = vpop.permute.xlu1 %651 }
 0x170   : > { %v1862_v48 = vpop.permute.xlu0 %649  ;;  %674 = vst.msk [vmem:[#allocation2 + $0x10] sm:$0xff] %vm621_vm1, %v1860_v47 }
 0x171   : > { %673 = vst.msk [vmem:[#allocation2] sm:$0xff] %vm621_vm1, %v1862_v48 }
 0x174   : > { %v1868_v49 = vpop.permute.xlu0 %655  ;;  %v1870_v50 = vpop.permute.xlu1 %653 }
 0x175   : > { %676 = vst.msk [vmem:[#allocation2 + $0x30] sm:$0xff] %vm621_vm1, %v1868_v49  ;;  %675 = vst.msk [vmem:[#allocation2 + $0x20] sm:$0xff] %vm621_vm1, %v1870_v50 }
 0x177   : > { %v682_v51 = vld [vmem:[#allocation2 + $0x11] sm:$0xff] }
 0x178   : > { %v1876_v52 = vpop.permute.xlu0 %659  ;;  %v690_v53 = vld [vmem:[#allocation2 + $0x10] sm:$0xff]  ;;  %v1878_v54 = vpop.permute.xlu1 %657  ;;  %716 = vrot.lane.b32.xlu0 %v682_v51, %s1713_s16  ;;  %v681_v60 = vld [vmem:[#allocation2 + $0x1] sm:$0xff] }
 0x179   : > { %678 = vst.msk [vmem:[#allocation2 + $0x50] sm:$0xff] %vm621_vm1, %v1876_v52  ;;  %746 = vrot.lane.b32.xlu1 %v690_v53, %s1710_s27  ;;  %677 = vst.msk [vmem:[#allocation2 + $0x40] sm:$0xff] %vm621_vm1, %v1878_v54  ;;  %v1181_v53 = vmul.u32 2, %v1173_v39 }
 0x17c   : > { %v1886_v55 = vpop.permute.xlu0 %663  ;;  %v1888_v56 = vpop.permute.xlu1 %661  ;;  %v684_v1 = vld [vmem:[#allocation2 + $0x31] sm:$0xff]  ;;  %v691_v5 = vld [vmem:[#allocation2 + $0x20] sm:$0xff] }
 0x17d   : > { %680 = vst.msk [vmem:[#allocation2 + $0x70] sm:$0xff] %vm621_vm1, %v1886_v55  ;;  %778 = vrot.lane.b32.xlu1 %v682_v51, %s1714_s17  ;;  %679 = vst.msk [vmem:[#allocation2 + $0x60] sm:$0xff] %vm621_vm1, %v1888_v56  ;;  %v692_v3 = vld [vmem:[#allocation2 + $0x30] sm:$0xff]  ;;  %v699_v11 = vld [vmem:[#allocation2 + $0x21] sm:$0xff]  ;;  %v1189_v51 = vand.u32 1, %v1157_v13 }
 0x180   : > { %v686_v57 = vld [vmem:[#allocation2 + $0x51] sm:$0xff]  ;;  %v693_v59 = vld [vmem:[#allocation2 + $0x40] sm:$0xff] }
 0x181   : > { %v694_v58 = vld [vmem:[#allocation2 + $0x50] sm:$0xff]  ;;  %724 = vrot.lane.b32.xlu0 %v686_v57, %s1713_s16  ;;  %v701_v61 = vld [vmem:[#allocation2 + $0x41] sm:$0xff] }
 0x182   : > { %754 = vrot.lane.b32.xlu1 %v694_v58, %s1710_s27  ;;  %v1190_v58 = vand.u32 1, %v1158_v16  ;;  %v1185_v16 = vmul.u32 2, %v1177_v8 }
 0x184   : > { %v688_v2 = vld [vmem:[#allocation2 + $0x71] sm:$0xff]  ;;  %v695_v37 = vld [vmem:[#allocation2 + $0x60] sm:$0xff] }
 0x185   : > { %752 = vrot.lane.b32.xlu0 %v693_v59, %s1710_s27  ;;  %v696_v24 = vld [vmem:[#allocation2 + $0x70] sm:$0xff]  ;;  %v687_v38 = vld [vmem:[#allocation2 + $0x61] sm:$0xff]  ;;  %v1175_v59 = vand.u32 1, %v1167_v41 }
 0x186   : > { %786 = vrot.lane.b32.xlu1 %v686_v57, %s1714_s17  ;;  %v1182_v57 = vmul.u32 2, %v1174_v40 }
 0x188   : > { %v1947_v4 = vadd.s32 %v1190_v58, %v1182_v57 }
 0x189   : > { %784 = vrot.lane.b32.xlu0 %v701_v61, %s1714_s17 }
 0x18a   : > { %714 = vrot.lane.b32.xlu1 %v681_v60, %s1713_s16  ;;  %v1544_v60 = vadd.s32 4294967295, %v1933_v42  ;;  %v1548_v10 = vadd.s32 4294967295, %v1947_v4 }
 0x18d   : > { %720 = vrot.lane.b32.xlu0 %v684_v1, %s1713_s16 }
 0x18e   : > { %722 = vrot.lane.b32.xlu1 %v701_v61, %s1713_s16  ;;  %v1176_v61 = vand.u32 1, %v1168_v43 }
 0x191   : > { %728 = vrot.lane.b32.xlu0 %v688_v2, %s1713_s16 }
 0x192   : > { %750 = vrot.lane.b32.xlu1 %v692_v3, %s1710_s27  ;;  %v1945_v3 = vadd.s32 %v1189_v51, %v1181_v53 }
 0x194   : > { %v1547_v9 = vadd.s32 4294967295, %v1945_v3 }
 0x195   : > { %748 = vrot.lane.b32.xlu0 %v691_v5, %s1710_s27  ;;  %v1183_v5 = vmul.u32 2, %v1175_v59 }
 0x196   : > { %782 = vrot.lane.b32.xlu1 %v684_v1, %s1714_s17  ;;  %v1546_v1 = vadd.s32 4294967295, %v1938_v46 }
 0x197   : > { %v1958_v12 = vadd.s32 %v1191_v6, %v1183_v5 }
 0x199   : > { %780 = vrot.lane.b32.xlu0 %v699_v11, %s1714_s17  ;;  %v1549_v21 = vadd.s32 4294967295, %v1958_v12 }
 0x19a   : > { %718 = vrot.lane.b32.xlu1 %v699_v11, %s1713_s16  ;;  %v1524_v11 = vld [vmem:[%s2287_s4] ss:$0 sm:$0xff] }
 0x19b   : > { %v546_v20 = vadd.f32 %v1524_v11, %v1841_v18  ;;  %v547_v29 = vadd.f32 %v1836_v14, %v1524_v11  ;;  %v548_v30 = vadd.f32 %v1524_v11, %v1851_v26  ;;  %v550_v32 = vadd.f32 %v1524_v11, %v1843_v19 }
 0x19c   : > { %v549_v33 = vadd.f32 %v1846_v22, %v1524_v11  ;;  %v551_v14 = vadd.f32 %v1838_v15, %v1524_v11  ;;  %v552_v26 = vadd.f32 %v1524_v11, %v1853_v27  ;;  %v553_v39 = vadd.f32 %v1848_v23, %v1524_v11 }
 0x19d   : > { %760 = vrot.lane.b32.xlu0 %v697_v17, %s1710_s27  ;;  %v1193_v17 = vand.u32 1, %v1161_v44  ;;  %v563_v31 = vmul.f32 %v562_v28, %v546_v20  ;;  %vm554_vm11 = vcmp.gt.f32.partialorder %v546_v20, 0.0  ;;  %v564_v35 = vmul.f32 %v562_v28, %v547_v29 }
 0x19e   : > { %758 = vrot.lane.b32.xlu1 %v696_v24, %s1710_s27  ;;  %v565_v36 = vmul.f32 %v562_v28, %v548_v30  ;;  %vm555_vm12 = vcmp.gt.f32.partialorder %v547_v29, 0.0  ;;  %vm556_vm13 = vcmp.gt.f32.partialorder %v548_v30, 0.0  ;;  %v566_v22 = vmul.f32 %v562_v28, %v549_v33 }
 0x19f   : > { %v1967_v25 = vadd.s32 %v1193_v17, %v1185_v16  ;;  %v1976_v34 = vsel %vm554_vm11, %v546_v20, %v563_v31  ;;  %vm557_vm14 = vcmp.gt.f32.partialorder %v549_v33, 0.0  ;;  %vm558_vm15 = vcmp.gt.f32.partialorder %v550_v32, 0.0 }
 0x1a0   : > { %v1985_v19 = vsel %vm556_vm13, %v548_v30, %v565_v36  ;;  %v1992_v40 = vsel %vm557_vm14, %v549_v33, %v566_v22  ;;  %v568_v27 = vmul.f32 %v562_v28, %v551_v14  ;;  %v569_v41 = vmul.f32 %v562_v28, %v552_v26 }
 0x1a1   : > { %756 = vrot.lane.b32.xlu0 %v695_v37, %s1710_s27  ;;  %v1551_v18 = vadd.s32 4294967295, %v1967_v25  ;;  %v1983_v37 = vsel %vm555_vm12, %v547_v29, %v564_v35  ;;  %vm559_vm2 = vcmp.gt.f32.partialorder %v551_v14, 0.0  ;;  %vm560_vm3 = vcmp.gt.f32.partialorder %v552_v26, 0.0 }
 0x1a2   : > { %726 = vrot.lane.b32.xlu1 %v687_v38, %s1713_s16  ;;  %v2000_v43 = vsel %vm559_vm2, %v551_v14, %v568_v27  ;;  %v2002_v44 = vsel %vm560_vm3, %v552_v26, %v569_v41  ;;  %v570_v51 = vmul.f32 %v562_v28, %v553_v39  ;;  %vm561_vm4 = vcmp.gt.f32.partialorder %v553_v39, 0.0 }
 0x1a4   : > { %v2008_v23 = vsel %vm561_vm4, %v553_v39, %v570_v51 }
 0x1a5   : > { %788 = vrot.lane.b32.xlu0 %v687_v38, %s1714_s17  ;;  %v567_v38 = vmul.f32 %v562_v28, %v550_v32 }
 0x1a6   : > { %790 = vrot.lane.b32.xlu1 %v688_v2, %s1714_s17  ;;  %v1184_v2 = vmul.u32 2, %v1176_v61 }
 0x1a7   : > { %v1994_v15 = vsel %vm558_vm15, %v550_v32, %v567_v38 }
 0x1a8   : > { %v1960_v13 = vadd.s32 %v1192_v7, %v1184_v2 }
 0x1a9   : > { %792 = vrot.lane.b32.xlu0 %v705_v63, %s1714_s17  ;;  %s1514_s17 = sld [smem:[#allocation3 + $0x3]] }
 0x1aa   : > { %1250 = vrot.lane.b32.xlu1 %v1544_v60, %s1710_s27  ;;  %v1550_v24 = vadd.s32 4294967295, %v1960_v13 }
 0x1ad   : > { %1252 = vrot.lane.b32.xlu0 %v1545_v0, %s1710_s27 }
 0x1ae   : > { %1254 = vrot.lane.b32.xlu1 %v1546_v1, %s1710_s27 }
 0x1b1   : > { %1256 = vrot.lane.b32.xlu0 %v1547_v9, %s1710_s27 }
 0x1b2   : > { %1258 = vrot.lane.b32.xlu1 %v1548_v10, %s1710_s27 }
 0x1b5   : > { %1260 = vrot.lane.b32.xlu0 %v1549_v21, %s1710_s27 }
 0x1b6   : > { %1262 = vrot.lane.b32.xlu1 %v1550_v24, %s1710_s27 }
 0x1b9   : > { %1264 = vrot.lane.b32.xlu0 %v1551_v18, %s1710_s27 }
 0x1ba   : > { %1210 = vrot.lane.b32.xlu1 %v1976_v34, %s1710_s27 }
 0x1bd   : > { %1212 = vrot.lane.b32.xlu0 %v1983_v37, %s1710_s27 }
 0x1be   : > { %1214 = vrot.lane.b32.xlu1 %v1985_v19, %s1710_s27 }
 0x1c1   : > { %1216 = vrot.lane.b32.xlu0 %v1992_v40, %s1710_s27 }
 0x1c2   : > { %1218 = vrot.lane.b32.xlu1 %v1994_v15, %s1710_s27 }
 0x1c5   : > { %1220 = vrot.lane.b32.xlu0 %v2000_v43, %s1710_s27 }
 0x1c6   : > { %1222 = vrot.lane.b32.xlu1 %v2002_v44, %s1710_s27 }
 0x1c9   : > { %1224 = vrot.lane.b32.xlu0 %v2008_v23, %s1710_s27 }
 0x1ea   : > { %v717_v57 = vpop.permute.xlu0 %716 }
 0x1eb   : > { %v747_v53 = vpop.permute.xlu1 %746  ;;  %v803_v16 = vsel %vm621_vm1, %v1860_v47, %v717_v57 }
 0x1ef   : > { %v779_v58 = vpop.permute.xlu1 %778 }
 0x1f3   : > { %v725_v59 = vpop.permute.xlu0 %724 }
 0x1f4   : > { %v755_v60 = vpop.permute.xlu1 %754  ;;  %v807_v14 = vsel %vm621_vm1, %v1876_v52, %v725_v59 }
 0x1f7   : > { %v753_v61 = vpop.permute.xlu0 %752 }
 0x1f8   : > { %v787_v62 = vpop.permute.xlu1 %786 }
 0x1fb   : > { %v785_v63 = vpop.permute.xlu0 %784 }
 0x1fc   : > { %v715_v0 = vpop.permute.xlu1 %714 }
 0x1fd   : > { %v802_v1 = vsel %vm621_vm1, %v1862_v48, %v715_v0 }
 0x1fe   : > { %v811_v5 = vsel %vm810_vm5, %v802_v1, %v747_v53 }
 0x1ff   : > { %v820_v6 = vsel %vm819_vm6, %v811_v5, %v779_v58  ;;  %v721_v2 = vpop.permute.xlu0 %720 }
 0x200   : > { %1615 = vmatprep.mubr.msk.f32.mxu1 %vm409_vm0, %v820_v6  ;;  %v723_v7 = vpop.permute.xlu1 %722  ;;  %v805_v17 = vsel %vm621_vm1, %v1868_v49, %v721_v2 }
 0x201   : > { %v806_v48 = vsel %vm621_vm1, %v1878_v54, %v723_v7  ;;  %v814_v30 = vsel %vm810_vm5, %v805_v17, %v753_v61 }
 0x202   : > { %v815_v47 = vsel %vm810_vm5, %v806_v48, %v755_v60  ;;  %v823_v32 = vsel %vm819_vm6, %v814_v30, %v785_v63  ;;  %v992_v30 = vld [vmem:[%s2291_s8 + $0x8] sm:$0xff] }
 0x203   : > { %v729_v8 = vpop.permute.xlu0 %728 }
 0x204   : > { %v751_v9 = vpop.permute.xlu1 %750  ;;  %v809_v51 = vsel %vm621_vm1, %v1886_v55, %v729_v8 }
 0x207   : > { %v749_v10 = vpop.permute.xlu0 %748 }
 0x208   : > { %v783_v11 = vpop.permute.xlu1 %782  ;;  %v812_v20 = vsel %vm810_vm5, %v803_v16, %v749_v10 }
 0x20b   : > { %v781_v21 = vpop.permute.xlu0 %780 }
 0x20c   : > { %v719_v24 = vpop.permute.xlu1 %718  ;;  %v821_v28 = vsel %vm819_vm6, %v812_v20, %v781_v21 }
 0x20d   : > { %v804_v29 = vsel %vm621_vm1, %v1870_v50, %v719_v24  ;;  %1616 = vmatmul.mubr.msk.f32.vlgmr.msra.gmra.mrb[4].mxu1 %vm409_vm0, %v821_v28  ;;  %v824_v50 = vsel %vm819_vm6, %v815_v47, %v787_v62 }
 0x20e   : > { %v813_v31 = vsel %vm810_vm5, %v804_v29, %v751_v9 }
 0x20f   : > { %v822_v49 = vsel %vm819_vm6, %v813_v31, %v783_v11  ;;  %v761_v54 = vpop.permute.xlu0 %760 }
 0x210   : > { %1618 = vmatprep.mubr.msk.f32.mxu1 %vm409_vm0, %v822_v49  ;;  %v759_v18 = vpop.permute.xlu1 %758  ;;  %v974_v49 = vstv %s1513_s12 }
 0x211   : > { %1619 = vmatmul.mubr.msk.f32.gmra.mrb[6].mxu1 %vm409_vm0, %v823_v32 }
 0x212   : > { %1621 = vmatprep.mubr.msk.f32.mxu1 %vm409_vm0, %v824_v50 }
 0x213   : > { %v757_v33 = vpop.permute.xlu0 %756 }
 0x214   : > { %v727_v35 = vpop.permute.xlu1 %726  ;;  %v816_v26 = vsel %vm810_vm5, %v807_v14, %v757_v33 }
 0x215   : > { %v808_v36 = vsel %vm621_vm1, %v1888_v56, %v727_v35  ;;  %v818_v56 = vsel %vm810_vm5, %v809_v51, %v761_v54 }
 0x216   : > { %v817_v38 = vsel %vm810_vm5, %v808_v36, %v759_v18 }
 0x217   : > { %v789_v22 = vpop.permute.xlu0 %788 }
 0x218   : > { %v791_v39 = vpop.permute.xlu1 %790  ;;  %v825_v27 = vsel %vm819_vm6, %v816_v26, %v789_v22 }
 0x219   : > { %v826_v41 = vsel %vm819_vm6, %v817_v38, %v791_v39  ;;  %1622 = vmatmul.mubr.msk.f32.gmra.mrb[8].mxu1 %vm409_vm0, %v825_v27 }
 0x21a   : > { %1624 = vmatprep.mubr.msk.f32.mxu1 %vm409_vm0, %v826_v41 }
 0x21b   : > { %v793_v52 = vpop.permute.xlu0 %792 }
 0x21c   : > { %v1251_v53 = vpop.permute.xlu1 %1250  ;;  %v827_v57 = vsel %vm819_vm6, %v818_v56, %v793_v52 }
 0x21d   : > { %1625 = vmatmul.mubr.msk.f32.gmra.mrb[10].mxu1 %vm409_vm0, %v827_v57  ;;  %v2054_v62 = vsel %vm810_vm5, %v1933_v42, %v1251_v53 }
 0x21e   : > { %vm1331_vm1 = vcmp.eq.s32.totalorder %v2054_v62, 2 }
 0x21f   : > { %v1253_v58 = vpop.permute.xlu0 %1252 }
 0x220   : > { %v1255_v59 = vpop.permute.xlu1 %1254  ;;  %v2059_v0 = vsel %vm810_vm5, %v1936_v45, %v1253_v58 }
 0x221   : > { %v2063_v1 = vsel %vm810_vm5, %v1938_v46, %v1255_v59  ;;  %vm1332_vm7 = vcmp.eq.s32.totalorder %v2059_v0, 2 }
 0x222   : > { %vm1333_vm8 = vcmp.eq.s32.totalorder %v2063_v1, 2 }
 0x223   : > { %v1257_v60 = vpop.permute.xlu0 %1256 }
 0x224   : > { %v1259_v61 = vpop.permute.xlu1 %1258  ;;  %v2076_v45 = vsel %vm810_vm5, %v1945_v3, %v1257_v60 }
 0x225   : > { %v2080_v46 = vsel %vm810_vm5, %v1947_v4, %v1259_v61  ;;  %vm1334_vm9 = vcmp.eq.s32.totalorder %v2076_v45, 2 }
 0x226   : > { %vm1335_vm10 = vcmp.eq.s32.totalorder %v2080_v46, 2 }
 0x227   : > { %v1261_v63 = vpop.permute.xlu0 %1260 }
 0x228   : > { %v1263_v55 = vpop.permute.xlu1 %1262  ;;  %v2100_v4 = vsel %vm810_vm5, %v1958_v12, %v1261_v63 }
 0x229   : > { %vm1336_vm11 = vcmp.eq.s32.totalorder %v2100_v4, 2 }
 0x22b   : > { %v1265_v5 = vpop.permute.xlu0 %1264 }
 0x22c   : > { %v1211_v6 = vpop.permute.xlu1 %1210 }
 0x22d   : > { %v2067_v2 = vsel %vm810_vm5, %v1976_v34, %v1211_v6 }
 0x22e   : > { %v2070_v42 = vsel %vm1331_vm1, %v2067_v2, 0.0 }
 0x22f   : > { %v1213_v7 = vpop.permute.xlu0 %1212 }
 0x230   : > { %v1215_v8 = vpop.permute.xlu1 %1214  ;;  %v2084_v34 = vsel %vm810_vm5, %v1983_v37, %v1213_v7  ;;  %v2104_v37 = vsel %vm810_vm5, %v1960_v13, %v1263_v55  ;;  %v2124_v13 = vsel %vm810_vm5, %v1967_v25, %v1265_v5 }
 0x231   : > { %v2088_v9 = vsel %vm810_vm5, %v1985_v19, %v1215_v8  ;;  %v2091_v10 = vsel %vm1332_vm7, %v2084_v34, 0.0  ;;  %vm1337_vm12 = vcmp.eq.s32.totalorder %v2104_v37, 2  ;;  %vm1338_vm13 = vcmp.eq.s32.totalorder %v2124_v13, 2 }
 0x232   : > { %v2094_v3 = vsel %vm1333_vm8, %v2088_v9, 0.0  ;;  %vm1275_vm7 = vcmp.eq.s32.totalorder %v2059_v0, 0  ;;  %vm1274_vm8 = vcmp.eq.s32.totalorder %v2054_v62, 0 }
 0x233   : > { %v1217_v19 = vpop.permute.xlu0 %1216  ;;  %v1282_v62 = vsel %vm1274_vm8, %v2067_v2, 0.0  ;;  %vm1281_vm8 = vcmp.eq.s32.totalorder %v2124_v13, 0 }
 0x234   : > { %v1219_v11 = vpop.permute.xlu1 %1218  ;;  %v2108_v16 = vsel %vm810_vm5, %v1992_v40, %v1217_v19 }
 0x235   : > { %v2112_v17 = vsel %vm810_vm5, %v1994_v15, %v1219_v11  ;;  %v2115_v48 = vsel %vm1334_vm9, %v2108_v16, 0.0 }
 0x236   : > { %v2118_v12 = vsel %vm1335_vm10, %v2112_v17, 0.0  ;;  %vm1277_vm10 = vcmp.eq.s32.totalorder %v2076_v45, 0 }
 0x237   : > { %v1221_v40 = vpop.permute.xlu0 %1220 }
 0x238   : > { %v1223_v20 = vpop.permute.xlu1 %1222  ;;  %v2128_v15 = vsel %vm810_vm5, %v2000_v43, %v1221_v40  ;;  %v2168_v40 = vld [vmem:[%s2292_s9] ss:$0 sm:$0xff] }
 0x239   : > { %v2132_v21 = vsel %vm810_vm5, %v2002_v44, %v1223_v20  ;;  %v2135_v24 = vsel %vm1336_vm11, %v2128_v15, 0.0  ;;  %v991_v44 = vld [vmem:[%s2291_s8] sm:$0xff] }
 0x23a   : > { %v2138_v28 = vsel %vm1337_vm12, %v2132_v21, 0.0  ;;  %v1651_v31 = vpack.c.bf16 %v992_v30, %v991_v44  ;;  %vm1276_vm12 = vcmp.eq.s32.totalorder %v2063_v1, 0  ;;  %v1285_v1 = vsel %vm1277_vm10, %v2108_v16, 0.0 }
 0x23b   : > { %v1225_v25 = vpop.permute.xlu0 %1224 }
 0x23c   : > { %v2143_v29 = vsel %vm810_vm5, %v2008_v23, %v1225_v25  ;;  %1652 = vmatprep.subr.bf16.mxu0 %v1651_v31  ;;  %v1526_v23 = vld [vmem:[%s2290_s7] ss:$0 sm:$0xff]  ;;  %v2170_v25 = vstv %s1514_s17 }
 0x23d   : > { %v2146_v43 = vsel %vm1338_vm13, %v2143_v29, 0.0  ;;  %1654 = vmatpush3.bf16.msra.mxu0 %v1651_v31 }
 0x2e0   : > { %v1617_v47 = vpop.f32.mrb[4].mxu1 }
 0x2e1   : > { %v933_v54 = vadd.f32 %v1617_v47, %v1526_v23  ;;  %v927_v18 = vpop.f32.mrb[5].mxu1 }
 0x2e2   : > { %v928_v32 = vadd.f32 %v1526_v23, %v927_v18 }
 0x2e3   : > { %v976_v50 = vmul.f32 %v974_v49, %v933_v54  ;;  %vm967_vm14 = vcmp.gt.f32.partialorder %v933_v54, 0.0 }
 0x2e4   : > { %vm966_vm15 = vcmp.gt.f32.partialorder %v928_v32, 0.0  ;;  %v975_v33 = vmul.f32 %v974_v49, %v928_v32  ;;  %v1620_v35 = vpop.f32.mrb[6].mxu1 }
 0x2e5   : > { %v943_v36 = vadd.f32 %v1620_v35, %v1526_v23  ;;  %v937_v14 = vpop.f32.mrb[7].mxu1  ;;  %v984_v38 = vsel %vm967_vm14, %v933_v54, %v976_v50  ;;  %v1283_v54 = vsel %vm1275_vm7, %v2084_v34, 0.0  ;;  %v2182_v50 = vstv %s1515_s18 }
 0x2e6   : > { %v938_v26 = vadd.f32 %v1526_v23, %v937_v14  ;;  %v983_v22 = vsel %vm966_vm15, %v928_v32, %v975_v33 }
 0x2e7   : > { %v978_v39 = vmul.f32 %v974_v49, %v943_v36  ;;  %1631 = vmatprep.mubr.msk.f32.mxu0 %vm409_vm0, %v983_v22  ;;  %vm969_vm2 = vcmp.gt.f32.partialorder %v943_v36, 0.0 }
 0x2e8   : > { %vm968_vm3 = vcmp.gt.f32.partialorder %v938_v26, 0.0  ;;  %v977_v27 = vmul.f32 %v974_v49, %v938_v26  ;;  %1632 = vmatmul.mubr.msk.f32.vlgmr.msra.gmra.mrb[4].mxu0 %vm409_vm0, %v984_v38 }
 0x2e9   : > { %v986_v51 = vsel %vm969_vm2, %v943_v36, %v978_v39  ;;  %v1284_v39 = vsel %vm1276_vm12, %v2088_v9, 0.0 }
 0x2ea   : > { %v985_v41 = vsel %vm968_vm3, %v938_v26, %v977_v27 }
 0x2eb   : > { %1634 = vmatprep.mubr.msk.f32.mxu0 %vm409_vm0, %v985_v41 }
 0x2ec   : > { %v1623_v56 = vpop.f32.mrb[8].mxu1  ;;  %1635 = vmatmul.mubr.msk.f32.gmra.mrb[6].mxu0 %vm409_vm0, %v986_v51 }
 0x2ed   : > { %v953_v52 = vadd.f32 %v1623_v56, %v1526_v23  ;;  %v947_v53 = vpop.f32.mrb[9].mxu1 }
 0x2ee   : > { %v948_v57 = vadd.f32 %v1526_v23, %v947_v53 }
 0x2ef   : > { %v980_v58 = vmul.f32 %v974_v49, %v953_v52  ;;  %vm971_vm4 = vcmp.gt.f32.partialorder %v953_v52, 0.0 }
 0x2f0   : > { %vm970_vm5 = vcmp.gt.f32.partialorder %v948_v57, 0.0  ;;  %v979_v59 = vmul.f32 %v974_v49, %v948_v57  ;;  %v1626_v60 = vpop.f32.mrb[10].mxu1 }
 0x2f1   : > { %v963_v61 = vadd.f32 %v1626_v60, %v1526_v23  ;;  %v957_v63 = vpop.f32.mrb[11].mxu1  ;;  %v988_v7 = vsel %vm971_vm4, %v953_v52, %v980_v58 }
 0x2f2   : > { %v958_v55 = vadd.f32 %v1526_v23, %v957_v63  ;;  %v987_v5 = vsel %vm970_vm5, %v948_v57, %v979_v59  ;;  %vm1279_vm5 = vcmp.eq.s32.totalorder %v2100_v4, 0 }
 0x2f3   : > { %v982_v6 = vmul.f32 %v974_v49, %v963_v61  ;;  %1637 = vmatprep.mubr.msk.f32.mxu0 %vm409_vm0, %v987_v5  ;;  %vm973_vm6 = vcmp.gt.f32.partialorder %v963_v61, 0.0  ;;  %v1287_v4 = vsel %vm1279_vm5, %v2128_v15, 0.0 }
 0x2f4   : > { %vm972_vm1 = vcmp.gt.f32.partialorder %v958_v55, 0.0  ;;  %v981_v8 = vmul.f32 %v974_v49, %v958_v55  ;;  %1638 = vmatmul.mubr.msk.f32.gmra.mrb[8].mxu0 %vm409_vm0, %v988_v7 }
 0x2f5   : > { %v990_v11 = vsel %vm973_vm6, %v963_v61, %v982_v6  ;;  %vm1278_vm6 = vcmp.eq.s32.totalorder %v2080_v46, 0 }
 0x2f6   : > { %v989_v19 = vsel %vm972_vm1, %v958_v55, %v981_v8  ;;  %v1286_v7 = vsel %vm1278_vm6, %v2112_v17, 0.0 }
 0x2f7   : > { %1640 = vmatprep.mubr.msk.f32.mxu0 %vm409_vm0, %v989_v19 }
 0x2f8   : > { %1641 = vmatmul.mubr.msk.f32.gmra.mrb[10].mxu0 %vm409_vm0, %v990_v11 }
 0x3bb   : > { %v1633_v20 = vpop.f32.mrb[4].mxu0 }
 0x3bc   : > { %v1096_v44 = vadd.f32 %v1633_v20, %v2168_v40  ;;  %v1090_v30 = vpop.f32.mrb[5].mxu0 }
 0x3bd   : > { %v1091_v31 = vadd.f32 %v2168_v40, %v1090_v30 }
 0x3be   : > { %v1139_v23 = vmul.f32 %v2170_v25, %v1096_v44  ;;  %vm1130_vm9 = vcmp.gt.f32.partialorder %v1096_v44, 0.0 }
 0x3bf   : > { %v1138_v47 = vmul.f32 %v2170_v25, %v1091_v31  ;;  %v1636_v49 = vpop.f32.mrb[6].mxu0  ;;  %vm1129_vm11 = vcmp.gt.f32.partialorder %v1091_v31, 0.0 }
 0x3c0   : > { %v1106_v18 = vadd.f32 %v1636_v49, %v2168_v40  ;;  %v1100_v32 = vpop.f32.mrb[7].mxu0  ;;  %v1147_v0 = vsel %vm1130_vm9, %v1096_v44, %v1139_v23  ;;  %vm1280_vm9 = vcmp.eq.s32.totalorder %v2104_v37, 0 }
 0x3c1   : > { %v1101_v33 = vadd.f32 %v2168_v40, %v1100_v32  ;;  %1357 = vrot.lane.b32.xlu0 %v1147_v0, %s1715_s22  ;;  %v1291_v35 = vadd.f32 %v1283_v54, %v1147_v0  ;;  %v1146_v36 = vsel %vm1129_vm11, %v1091_v31, %v1138_v47  ;;  %v1288_v31 = vsel %vm1280_vm9, %v2132_v21, 0.0 }
 0x3c2   : > { %v1141_v14 = vmul.f32 %v2170_v25, %v1106_v18  ;;  %v1290_v34 = vadd.f32 %v1282_v62, %v1146_v36  ;;  %1355 = vrot.lane.b32.xlu1 %v1146_v36, %s1715_s22  ;;  %vm1132_vm13 = vcmp.gt.f32.partialorder %v1106_v18, 0.0 }
 0x3c3   : > { %v1140_v2 = vmul.f32 %v2170_v25, %v1101_v33  ;;  %vm1299_vm14 = vcmp.gt.f32.partialorder %v1291_v35, 0.0  ;;  %v1308_v26 = vmul.f32 %v2182_v50, %v1291_v35  ;;  %vm1131_vm15 = vcmp.gt.f32.partialorder %v1101_v33, 0.0 }
 0x3c4   : > { %vm1298_vm2 = vcmp.gt.f32.partialorder %v1290_v34, 0.0  ;;  %v1307_v22 = vmul.f32 %v2182_v50, %v1290_v34  ;;  %v1149_v38 = vsel %vm1132_vm13, %v1106_v18, %v1141_v14 }
 0x3c5   : > { %v1316_v27 = vsel %vm1299_vm14, %v1291_v35, %v1308_v26  ;;  %1361 = vrot.lane.b32.xlu0 %v1149_v38, %s1715_s22  ;;  %v1293_v41 = vadd.f32 %v1285_v1, %v1149_v38  ;;  %v1148_v51 = vsel %vm1131_vm15, %v1101_v33, %v1140_v2 }
 0x3c6   : > { %1324 = vst.msk [vmem:[%s2193_s24 + $0x10] sm:$0xff] %vm409_vm0, %v1316_v27  ;;  %v1315_v56 = vsel %vm1298_vm2, %v1290_v34, %v1307_v22  ;;  %1359 = vrot.lane.b32.xlu1 %v1148_v51, %s1715_s22  ;;  %v1292_v52 = vadd.f32 %v1284_v39, %v1148_v51 }
 0x3c7   : > { %1323 = vst.msk [vmem:[%s2193_s24] sm:$0xff] %vm409_vm0, %v1315_v56  ;;  %vm1301_vm3 = vcmp.gt.f32.partialorder %v1293_v41, 0.0  ;;  %v1310_v45 = vmul.f32 %v2182_v50, %v1293_v41  ;;  %v1639_v16 = vpop.f32.mrb[8].mxu0 }
 0x3c8   : > { %vm1300_vm4 = vcmp.gt.f32.partialorder %v1292_v52, 0.0  ;;  %v1309_v9 = vmul.f32 %v2182_v50, %v1292_v52  ;;  %v1116_v53 = vadd.f32 %v1639_v16, %v2168_v40  ;;  %v1110_v57 = vpop.f32.mrb[9].mxu0 }
 0x3c9   : > { %v1318_v58 = vsel %vm1301_vm3, %v1293_v41, %v1310_v45  ;;  %v1111_v59 = vadd.f32 %v2168_v40, %v1110_v57 }
 0x3ca   : > { %1326 = vst.msk [vmem:[%s2193_s24 + $0x30] sm:$0xff] %vm409_vm0, %v1318_v58  ;;  %v1317_v60 = vsel %vm1300_vm4, %v1292_v52, %v1309_v9  ;;  %v1143_v61 = vmul.f32 %v2170_v25, %v1116_v53  ;;  %vm1134_vm1 = vcmp.gt.f32.partialorder %v1116_v53, 0.0 }
 0x3cb   : > { %1325 = vst.msk [vmem:[%s2193_s24 + $0x20] sm:$0xff] %vm409_vm0, %v1317_v60  ;;  %v1142_v63 = vmul.f32 %v2170_v25, %v1111_v59  ;;  %v1642_v55 = vpop.f32.mrb[10].mxu0  ;;  %vm1133_vm7 = vcmp.gt.f32.partialorder %v1111_v59, 0.0 }
 0x3cc   : > { %v1126_v5 = vadd.f32 %v1642_v55, %v2168_v40  ;;  %v1120_v6 = vpop.f32.mrb[11].mxu0  ;;  %v1151_v46 = vsel %vm1134_vm1, %v1116_v53, %v1143_v61 }
 0x3cd   : > { %v1121_v8 = vadd.f32 %v2168_v40, %v1120_v6  ;;  %1365 = vrot.lane.b32.xlu0 %v1151_v46, %s1715_s22  ;;  %v1295_v19 = vadd.f32 %v1287_v4, %v1151_v46  ;;  %v1150_v11 = vsel %vm1133_vm7, %v1111_v59, %v1142_v63  ;;  %v1289_v40 = vsel %vm1281_vm8, %v2143_v29, 0.0 }
 0x3ce   : > { %v1145_v20 = vmul.f32 %v2170_v25, %v1126_v5  ;;  %1363 = vrot.lane.b32.xlu1 %v1150_v11, %s1715_s22  ;;  %v1294_v15 = vadd.f32 %v1286_v7, %v1150_v11  ;;  %vm1136_vm10 = vcmp.gt.f32.partialorder %v1126_v5, 0.0 }
 0x3cf   : > { %v1144_v44 = vmul.f32 %v2170_v25, %v1121_v8  ;;  %vm1303_vm11 = vcmp.gt.f32.partialorder %v1295_v19, 0.0  ;;  %v1312_v17 = vmul.f32 %v2182_v50, %v1295_v19  ;;  %vm1135_vm12 = vcmp.gt.f32.partialorder %v1121_v8, 0.0 }
 0x3d0   : > { %vm1302_vm13 = vcmp.gt.f32.partialorder %v1294_v15, 0.0  ;;  %v1311_v37 = vmul.f32 %v2182_v50, %v1294_v15  ;;  %v1153_v30 = vsel %vm1136_vm10, %v1126_v5, %v1145_v20 }
 0x3d1   : > { %v1320_v23 = vsel %vm1303_vm11, %v1295_v19, %v1312_v17  ;;  %1369 = vrot.lane.b32.xlu0 %v1153_v30, %s1715_s22  ;;  %v1297_v25 = vadd.f32 %v1289_v40, %v1153_v30  ;;  %v1152_v47 = vsel %vm1135_vm12, %v1121_v8, %v1144_v44 }
 0x3d2   : > { %1328 = vst.msk [vmem:[%s2193_s24 + $0x50] sm:$0xff] %vm409_vm0, %v1320_v23  ;;  %v1319_v49 = vsel %vm1302_vm13, %v1294_v15, %v1311_v37  ;;  %1367 = vrot.lane.b32.xlu1 %v1152_v47, %s1715_s22  ;;  %v1296_v13 = vadd.f32 %v1288_v31, %v1152_v47 }
 0x3d3   : > { %1327 = vst.msk [vmem:[%s2193_s24 + $0x40] sm:$0xff] %vm409_vm0, %v1319_v49  ;;  %vm1305_vm14 = vcmp.gt.f32.partialorder %v1297_v25, 0.0  ;;  %v1314_v29 = vmul.f32 %v2182_v50, %v1297_v25 }
 0x3d4   : > { %vm1304_vm15 = vcmp.gt.f32.partialorder %v1296_v13, 0.0  ;;  %v1313_v21 = vmul.f32 %v2182_v50, %v1296_v13 }
 0x3d5   : > { %v1322_v54 = vsel %vm1305_vm14, %v1297_v25, %v1314_v29 }
 0x3d6   : > { %1330 = vst.msk [vmem:[%s2193_s24 + $0x70] sm:$0xff] %vm409_vm0, %v1322_v54  ;;  %v1321_v18 = vsel %vm1304_vm15, %v1296_v13, %v1313_v21 }
 0x3d7   : > { %1329 = vst.msk [vmem:[%s2193_s24 + $0x60] sm:$0xff] %vm409_vm0, %v1321_v18 }
 0x433   : > { %v1358_v32 = vpop.permute.xlu0 %1357 }
 0x434   : > { %v1380_v0 = vadd.f32 %v1358_v32, %v2091_v10  ;;  %v1356_v62 = vpop.permute.xlu1 %1355 }
 0x435   : > { %v1379_v33 = vadd.f32 %v1356_v62, %v2070_v42 }
 0x436   : > { %vm1388_vm2 = vcmp.gt.f32.partialorder %v1380_v0, 0.0  ;;  %v1396_v35 = vmul.f32 %v1380_v0, %v2182_v50 }
 0x437   : > { %vm1387_vm3 = vcmp.gt.f32.partialorder %v1379_v33, 0.0  ;;  %v1395_v36 = vmul.f32 %v1379_v33, %v2182_v50  ;;  %v1362_v14 = vpop.permute.xlu0 %1361 }
 0x438   : > { %v1404_v34 = vsel %vm1388_vm2, %v1380_v0, %v1396_v35  ;;  %v1382_v2 = vadd.f32 %v1362_v14, %v2115_v48  ;;  %v1360_v26 = vpop.permute.xlu1 %1359 }
 0x439   : > { %1553 = vst.msk [vmem:[%s2193_s24 + $0x18] sm:$0xff] %vm409_vm0, %v1404_v34  ;;  %v1403_v1 = vsel %vm1387_vm3, %v1379_v33, %v1395_v36  ;;  %v1381_v10 = vadd.f32 %v1360_v26, %v2094_v3 }
 0x43a   : > { %1552 = vst.msk [vmem:[%s2193_s24 + $0x8] sm:$0xff] %vm409_vm0, %v1403_v1  ;;  %vm1390_vm4 = vcmp.gt.f32.partialorder %v1382_v2, 0.0  ;;  %v1398_v42 = vmul.f32 %v1382_v2, %v2182_v50 }
 0x43b   : > { %vm1389_vm5 = vcmp.gt.f32.partialorder %v1381_v10, 0.0  ;;  %v1397_v22 = vmul.f32 %v1381_v10, %v2182_v50 }
 0x43c   : > { %v1406_v38 = vsel %vm1390_vm4, %v1382_v2, %v1398_v42 }
 0x43d   : > { %1555 = vst.msk [vmem:[%s2193_s24 + $0x38] sm:$0xff] %vm409_vm0, %v1406_v38  ;;  %v1405_v39 = vsel %vm1389_vm5, %v1381_v10, %v1397_v22 }
 0x43e   : > { %1554 = vst.msk [vmem:[%s2193_s24 + $0x28] sm:$0xff] %vm409_vm0, %v1405_v39 }
 0x43f   : > { %v1366_v48 = vpop.permute.xlu0 %1365 }
 0x440   : > { %v1384_v27 = vadd.f32 %v1366_v48, %v2135_v24  ;;  %v1364_v3 = vpop.permute.xlu1 %1363 }
 0x441   : > { %v1383_v41 = vadd.f32 %v1364_v3, %v2118_v12 }
 0x442   : > { %vm1392_vm6 = vcmp.gt.f32.partialorder %v1384_v27, 0.0  ;;  %v1400_v51 = vmul.f32 %v1384_v27, %v2182_v50 }
 0x443   : > { %vm1391_vm1 = vcmp.gt.f32.partialorder %v1383_v41, 0.0  ;;  %v1399_v56 = vmul.f32 %v1383_v41, %v2182_v50  ;;  %v1370_v52 = vpop.permute.xlu0 %1369 }
 0x444   : > { %v1408_v45 = vsel %vm1392_vm6, %v1384_v27, %v1400_v51  ;;  %v1386_v16 = vadd.f32 %v1370_v52, %v2146_v43  ;;  %v1368_v9 = vpop.permute.xlu1 %1367 }
 0x445   : > { %1557 = vst.msk [vmem:[%s2193_s24 + $0x58] sm:$0xff] %vm409_vm0, %v1408_v45  ;;  %v1407_v53 = vsel %vm1391_vm1, %v1383_v41, %v1399_v56  ;;  %v1385_v24 = vadd.f32 %v1368_v9, %v2138_v28 }
 0x446   : > { %1556 = vst.msk [vmem:[%s2193_s24 + $0x48] sm:$0xff] %vm409_vm0, %v1407_v53  ;;  %vm1394_vm7 = vcmp.gt.f32.partialorder %v1386_v16, 0.0  ;;  %v1402_v12 = vmul.f32 %v1386_v16, %v2182_v50 }
 0x447   : > { %vm1393_vm8 = vcmp.gt.f32.partialorder %v1385_v24, 0.0  ;;  %v1401_v57 = vmul.f32 %v1385_v24, %v2182_v50 }
 0x448   : > { %v1410_v58 = vsel %vm1394_vm7, %v1386_v16, %v1402_v12 }
 0x449   : > { %1559 = vst.msk [vmem:[%s2193_s24 + $0x78] sm:$0xff] %vm409_vm0, %v1410_v58  ;;  %v1409_v59 = vsel %vm1393_vm8, %v1385_v24, %v1401_v57 }
 0x44a   : > { %1558 = vst.msk [vmem:[%s2193_s24 + $0x68] sm:$0xff] %vm409_vm0, %v1409_v59 }
 0x44b PF: > { %s21_s13 = sadd.s32 1, %s1707_s13  }
 0x44c   : > { %p18_p1 = scmp.ge.s32.totalorder %s21_s13, 4  }
 0x44e   :  { %20 = sbr.rel (!%p18_p1) target bundleno = 1 (0x1), region = 100 }
 0x455   :  { %1441 = vsyncpa [#allocation4], 1 }
 0x456   :  { %1443 = vsyncpa [#allocation4 + $0x1], 1 }

</bundles_post_ra>
